<compile_context>
chip_gen: v7x
topology: tpu7x:2x2x1
jax: 0.10.0
libtpu: 0.0.40
codegen_flags: <defaults>
</compile_context>

<pallas_src>
import jax
import jax.numpy as jnp
from jax.experimental import pallas as pl
from jax.experimental.pallas import tpu as pltpu

LANES = 128


def _round_up(x, m):
    return (x + m - 1) // m * m


# ----------------------------------------------------------------------------
# Fused kernel: one batch element -> 4 stage outputs (transposed layout).
# ----------------------------------------------------------------------------
def _build_fused_kernel(meta):
    """meta: per-stage dicts of static ints (shapes + slab row offsets)."""

    def kernel(x_ref, slab_ref, *out_refs):
        f = x_ref[0]                      # (Win0, Cin*Hin) for this batch elem
        for i, sm in enumerate(meta):
            k, ow_p = sm["k"], sm["OW_p"]
            r_in, r_out = sm["R_in"], sm["R_out"]

            # Row-subsample all kw offsets at once: (k*OW_p, R_in).
            cs = slab_ref[sm["cs_off"]:sm["cs_off"] + sm["cs_rows"],
                          :sm["cs_cols"]]
            g = jnp.dot(cs, f, preferred_element_type=jnp.float32)

            # Accumulate the k banded operators (static unroll, k <= 7).
            # LHS has only OW_p rows; all row slices are 8-aligned.
            acc = jnp.dot(g[0:ow_p, :],
                          slab_ref[sm["m_off"]:sm["m_off"] + r_in, :r_out],
                          preferred_element_type=jnp.float32)
            for kw in range(1, k):
                off = sm["m_off"] + kw * sm["Rin_pad"]
                acc = acc + jnp.dot(g[kw * ow_p:(kw + 1) * ow_p, :],
                                    slab_ref[off:off + r_in, :r_out],
                                    preferred_element_type=jnp.float32)

            bias = slab_ref[sm["bias_off"]:sm["bias_off"] + 1, :r_out]
            o = acc + bias                # (OW_p, R_out); padded rows get bias
            out_refs[i][0] = o            # OW_p-wide, near lane-dense store
            f = o                         # next stage input (padded rows are
                                          # never selected by its CS_T)

    return kernel


# ----------------------------------------------------------------------------
# Host-side prep: turn Conv2d weights into transposed matmul operators and
# pack everything into a single (rows, 128) float32 slab.
# ----------------------------------------------------------------------------
def prepare_depth_downsample(params, in_shape):
    """params: list of dict(weight, bias, patch_size, stride); in_shape=(Cin,H,W)."""
    Cin, H, W = in_shape
    win_c = W                 # carried (storage) input width of current stage
    meta, blocks = [], []
    row = 0
    for p in params:
        w, b = p["weight"], p["bias"]
        k, s = p["patch_size"], p["stride"]
        Cout = w.shape[0]
        OH = (H - k) // s + 1
        OW = (W - k) // s + 1
        OW_p = _round_up(OW, 8)
        R_in, R_out = Cin * H, Cout * OH
        Rin_pad = _round_up(R_in, 8)
        assert R_out <= LANES and win_c <= LANES

        # M_T[kw][(c,h),(co,oh)] = W[co,c,h-s*oh,kw] if 0 <= h-s*oh < k else 0
        oh = jnp.arange(OH)
        h = jnp.arange(H)
        kh = h[None, :] - s * oh[:, None]                     # (OH, H)
        valid = (kh >= 0) & (kh < k)
        khc = jnp.clip(kh, 0, k - 1)
        wg = w[:, :, khc, :]                                  # (Cout,Cin,OH,H,k)
        wg = wg * valid[None, None, :, :, None].astype(w.dtype)
        MT = jnp.transpose(wg, (4, 1, 3, 0, 2)).reshape(k, R_in, R_out)

        # CS_T[kw*OW_p + ow, w] = 1 iff w == s*ow+kw and ow < OW.
        kw_i = jnp.arange(k)[:, None, None]
        ow_i = jnp.arange(OW_p)[None, :, None]
        w_i = jnp.arange(win_c)[None, None, :]
        CST = ((w_i == s * ow_i + kw_i) & (ow_i < OW)).astype(jnp.float32)
        CST = CST.reshape(k * OW_p, win_c)

        bias_row = jnp.repeat(b, OH)[None, :]                 # (1, R_out)

        cs_off = row
        blocks.append((cs_off, win_c, CST))
        row += k * OW_p
        bias_off = row
        blocks.append((bias_off, R_out, bias_row))
        row += 8                                              # keep 8-aligned
        m_off = row
        for kw in range(k):
            blocks.append((m_off + kw * Rin_pad, R_out, MT[kw]))
        row += k * Rin_pad

        meta.append(dict(k=k, OW=OW, OW_p=OW_p, R_in=R_in, R_out=R_out,
                         Rin_pad=Rin_pad, cs_off=cs_off, cs_rows=k * OW_p,
                         cs_cols=win_c, bias_off=bias_off, m_off=m_off,
                         Cout=Cout, OH=OH))
        Cin, H, W = Cout, OH, OW
        win_c = OW_p                                          # chain padded width

    tot_rows = _round_up(row, 8)
    slab = jnp.zeros((tot_rows, LANES), jnp.float32)
    for off, cols, arr in blocks:
        slab = slab.at[off:off + arr.shape[0], :cols].set(arr.astype(jnp.float32))
    return dict(slab=slab, meta=meta)


# ----------------------------------------------------------------------------
# Forward: one pallas_call for all 4 stages; host trims OW_p padding + NCHW.
# ----------------------------------------------------------------------------
def depth_downsample_forward(x, prepared):
    meta, slab = prepared["meta"], prepared["slab"]
    B, Cin, H, W = x.shape
    # Transposed "NCHW-flattened" layout: (B, Win, Cin*Hin). Tiny host-side op.
    x_t = jnp.swapaxes(x.reshape(B, Cin * H, W), 1, 2)

    out_specs, out_shapes = [], []
    for sm in meta:
        out_specs.append(pl.BlockSpec((1, sm["OW_p"], sm["R_out"]),
                                      lambda b: (b, 0, 0)))
        out_shapes.append(
            jax.ShapeDtypeStruct((B, sm["OW_p"], sm["R_out"]), jnp.float32))

    outs_t = pl.pallas_call(
        _build_fused_kernel(meta),
        grid=(B,),
        in_specs=[
            pl.BlockSpec((1, W, Cin * H), lambda b: (b, 0, 0)),
            # Constant operator slab: constant index map -> DMA'd once and
            # VMEM-resident across all grid steps.
            pl.BlockSpec(slab.shape, lambda b: (0, 0)),
        ],
        out_specs=tuple(out_specs),
        out_shape=tuple(out_shapes),
        compiler_params=pltpu.CompilerParams(
            dimension_semantics=("parallel",)),
    )(x_t, slab)

    # Trim OW_p padding and relayout to NCHW on the host (tiny tensors).
    outs = []
    for o_t, sm in zip(outs_t, meta):
        ow, cout, oh = sm["OW"], sm["Cout"], sm["OH"]
        o = o_t[:, :ow, :].reshape(B, ow, cout, oh).transpose(0, 2, 3, 1)
        outs.append(o)
    return outs


# ----------------------------------------------------------------------------
# Deterministic synthetic parameters (PyTorch Conv2d-style uniform init).
# ----------------------------------------------------------------------------
def init_depth_downsample_params(key, in_channels=1, embed_dims=8,
                                 num_heads=(1, 2, 4, 8),
                                 patch_sizes=(7, 3, 3, 3),   # overlap=True
                                 strides=(4, 2, 2, 2)):
    assert in_channels == 1
    params = []
    cin = in_channels
    for i in range(len(num_heads)):
        cout = embed_dims * num_heads[i]
        k = patch_sizes[i]
        key, wk, bk = jax.random.split(key, 3)
        fan_in = cin * k * k
        bound = 1.0 / (fan_in ** 0.5)
        w = jax.random.uniform(wk, (cout, cin, k, k), jnp.float32, -bound, bound)
        b = jax.random.uniform(bk, (cout,), jnp.float32, -bound, bound)
        params.append(dict(weight=w, bias=b, patch_size=k, stride=strides[i]))
        cin = cout
    return params


if __name__ == "__main__":
    key = jax.random.PRNGKey(0)
    kx, kp = jax.random.split(key)
    # small shapes: B=2, in_channels=1, 63x63 input -> stage spatial 15,7,3,1
    B, H, W = 2, 63, 63
    x = jax.random.normal(kx, (B, 1, H, W), jnp.float32)
    params = init_depth_downsample_params(kp, in_channels=1, embed_dims=8)
    prepared = prepare_depth_downsample(params, (1, H, W))

    outs = depth_downsample_forward(x, prepared)
    outs = jax.block_until_ready(outs)

    # pure-JAX reference (XLA conv) for each stage
    ref = x
    for p, o in zip(params, outs):
        ref = jax.lax.conv_general_dilated(
            ref, p["weight"], (p["stride"], p["stride"]), "VALID",
            dimension_numbers=("NCHW", "OIHW", "NCHW"),
        ) + p["bias"][None, :, None, None]
        assert o.shape == ref.shape, (o.shape, ref.shape)
        err = float(jnp.max(jnp.abs(o - ref)))
        assert jnp.allclose(o, ref, rtol=1e-3, atol=1e-3), err

    print("KERNEL_OK")
</pallas_src>

<mosaic_0001>
module attributes {stable_mosaic.version = 11 : i64} {
  func.func @kernel(%arg0: i32, %arg1: memref<1x63x63xf32, #tpu.memory_space<vmem>>, %arg2: memref<1648x128xf32, #tpu.memory_space<vmem>>, %arg3: memref<1x16x120xf32, #tpu.memory_space<vmem>>, %arg4: memref<1x8x112xf32, #tpu.memory_space<vmem>>, %arg5: memref<1x8x96xf32, #tpu.memory_space<vmem>>, %arg6: memref<1x8x64xf32, #tpu.memory_space<vmem>>) attributes {dimension_semantics = [#tpu.dimension_semantics<parallel>], iteration_bounds = array<i64: 2>, scalar_prefetch = 0 : i64, scratch_operands = 0 : i64, tpu.core_type = #tpu.core_type<tc>, window_params = [{transform_indices = @transform_0, window_bounds = array<i64: 1, 63, 63>}, {pipeline_mode = #tpu.pipeline_mode<synchronous>, transform_indices = @transform_1, window_bounds = array<i64: 1648, 128>}, {transform_indices = @transform_2, window_bounds = array<i64: 1, 16, 120>}, {transform_indices = @transform_3, window_bounds = array<i64: 1, 8, 112>}, {transform_indices = @transform_4, window_bounds = array<i64: 1, 8, 96>}, {transform_indices = @transform_5, window_bounds = array<i64: 1, 8, 64>}]} {
    %c0 = arith.constant 0 : index
    %c0_0 = arith.constant 0 : index
    %c0_1 = arith.constant 0 : index
    %0 = vector.load %arg1[%c0, %c0_0, %c0_1] : memref<1x63x63xf32, #tpu.memory_space<vmem>>, vector<1x63x63xf32>
    %1 = vector.shape_cast %0 : vector<1x63x63xf32> to vector<63x63xf32>
    %c0_2 = arith.constant 0 : index
    %c0_3 = arith.constant 0 : index
    %2 = vector.load %arg2[%c0_2, %c0_3] : memref<1648x128xf32, #tpu.memory_space<vmem>>, vector<112x63xf32>
    %cst = arith.constant dense<0.000000e+00> : vector<112x63xf32>
    %3 = tpu.matmul %2, %1, %cst {dimension_numbers = #tpu.dot_dimension_numbers<[1], [0], [0], [1], [0, 0, 1, 1], [], []>} : vector<112x63xf32>, vector<63x63xf32>, vector<112x63xf32> -> vector<112x63xf32>
    %4 = vector.extract_strided_slice %3 {offsets = [0, 0], sizes = [16, 63], strides = [1, 1]} : vector<112x63xf32> to vector<16x63xf32>
    %c120 = arith.constant 120 : index
    %c0_4 = arith.constant 0 : index
    %5 = vector.load %arg2[%c120, %c0_4] : memref<1648x128xf32, #tpu.memory_space<vmem>>, vector<63x120xf32>
    %cst_5 = arith.constant dense<0.000000e+00> : vector<16x120xf32>
    %6 = tpu.matmul %4, %5, %cst_5 {dimension_numbers = #tpu.dot_dimension_numbers<[1], [0], [0], [1], [0, 0, 1, 1], [], []>} : vector<16x63xf32>, vector<63x120xf32>, vector<16x120xf32> -> vector<16x120xf32>
    %7 = vector.extract_strided_slice %3 {offsets = [16, 0], sizes = [16, 63], strides = [1, 1]} : vector<112x63xf32> to vector<16x63xf32>
    %c184 = arith.constant 184 : index
    %c0_6 = arith.constant 0 : index
    %8 = vector.load %arg2[%c184, %c0_6] : memref<1648x128xf32, #tpu.memory_space<vmem>>, vector<63x120xf32>
    %cst_7 = arith.constant dense<0.000000e+00> : vector<16x120xf32>
    %9 = tpu.matmul %7, %8, %cst_7 {dimension_numbers = #tpu.dot_dimension_numbers<[1], [0], [0], [1], [0, 0, 1, 1], [], []>} : vector<16x63xf32>, vector<63x120xf32>, vector<16x120xf32> -> vector<16x120xf32>
    %10 = arith.addf %6, %9 : vector<16x120xf32>
    %11 = vector.extract_strided_slice %3 {offsets = [32, 0], sizes = [16, 63], strides = [1, 1]} : vector<112x63xf32> to vector<16x63xf32>
    %c248 = arith.constant 248 : index
    %c0_8 = arith.constant 0 : index
    %12 = vector.load %arg2[%c248, %c0_8] : memref<1648x128xf32, #tpu.memory_space<vmem>>, vector<63x120xf32>
    %cst_9 = arith.constant dense<0.000000e+00> : vector<16x120xf32>
    %13 = tpu.matmul %11, %12, %cst_9 {dimension_numbers = #tpu.dot_dimension_numbers<[1], [0], [0], [1], [0, 0, 1, 1], [], []>} : vector<16x63xf32>, vector<63x120xf32>, vector<16x120xf32> -> vector<16x120xf32>
    %14 = arith.addf %10, %13 : vector<16x120xf32>
    %15 = vector.extract_strided_slice %3 {offsets = [48, 0], sizes = [16, 63], strides = [1, 1]} : vector<112x63xf32> to vector<16x63xf32>
    %c312 = arith.constant 312 : index
    %c0_10 = arith.constant 0 : index
    %16 = vector.load %arg2[%c312, %c0_10] : memref<1648x128xf32, #tpu.memory_space<vmem>>, vector<63x120xf32>
    %cst_11 = arith.constant dense<0.000000e+00> : vector<16x120xf32>
    %17 = tpu.matmul %15, %16, %cst_11 {dimension_numbers = #tpu.dot_dimension_numbers<[1], [0], [0], [1], [0, 0, 1, 1], [], []>} : vector<16x63xf32>, vector<63x120xf32>, vector<16x120xf32> -> vector<16x120xf32>
    %18 = arith.addf %14, %17 : vector<16x120xf32>
    %19 = vector.extract_strided_slice %3 {offsets = [64, 0], sizes = [16, 63], strides = [1, 1]} : vector<112x63xf32> to vector<16x63xf32>
    %c376 = arith.constant 376 : index
    %c0_12 = arith.constant 0 : index
    %20 = vector.load %arg2[%c376, %c0_12] : memref<1648x128xf32, #tpu.memory_space<vmem>>, vector<63x120xf32>
    %cst_13 = arith.constant dense<0.000000e+00> : vector<16x120xf32>
    %21 = tpu.matmul %19, %20, %cst_13 {dimension_numbers = #tpu.dot_dimension_numbers<[1], [0], [0], [1], [0, 0, 1, 1], [], []>} : vector<16x63xf32>, vector<63x120xf32>, vector<16x120xf32> -> vector<16x120xf32>
    %22 = arith.addf %18, %21 : vector<16x120xf32>
    %23 = vector.extract_strided_slice %3 {offsets = [80, 0], sizes = [16, 63], strides = [1, 1]} : vector<112x63xf32> to vector<16x63xf32>
    %c440 = arith.constant 440 : index
    %c0_14 = arith.constant 0 : index
    %24 = vector.load %arg2[%c440, %c0_14] : memref<1648x128xf32, #tpu.memory_space<vmem>>, vector<63x120xf32>
    %cst_15 = arith.constant dense<0.000000e+00> : vector<16x120xf32>
    %25 = tpu.matmul %23, %24, %cst_15 {dimension_numbers = #tpu.dot_dimension_numbers<[1], [0], [0], [1], [0, 0, 1, 1], [], []>} : vector<16x63xf32>, vector<63x120xf32>, vector<16x120xf32> -> vector<16x120xf32>
    %26 = arith.addf %22, %25 : vector<16x120xf32>
    %27 = vector.extract_strided_slice %3 {offsets = [96, 0], sizes = [16, 63], strides = [1, 1]} : vector<112x63xf32> to vector<16x63xf32>
    %c504 = arith.constant 504 : index
    %c0_16 = arith.constant 0 : index
    %28 = vector.load %arg2[%c504, %c0_16] : memref<1648x128xf32, #tpu.memory_space<vmem>>, vector<63x120xf32>
    %cst_17 = arith.constant dense<0.000000e+00> : vector<16x120xf32>
    %29 = tpu.matmul %27, %28, %cst_17 {dimension_numbers = #tpu.dot_dimension_numbers<[1], [0], [0], [1], [0, 0, 1, 1], [], []>} : vector<16x63xf32>, vector<63x120xf32>, vector<16x120xf32> -> vector<16x120xf32>
    %30 = arith.addf %26, %29 : vector<16x120xf32>
    %c112 = arith.constant 112 : index
    %c0_18 = arith.constant 0 : index
    %31 = vector.load %arg2[%c112, %c0_18] : memref<1648x128xf32, #tpu.memory_space<vmem>>, vector<1x120xf32>
    %32 = vector.broadcast %31 : vector<1x120xf32> to vector<16x120xf32>
    %33 = arith.addf %30, %32 : vector<16x120xf32>
    %c0_19 = arith.constant 0 : index
    %c0_20 = arith.constant 0 : index
    %c0_21 = arith.constant 0 : index
    %34 = vector.load %arg3[%c0_19, %c0_20, %c0_21] : memref<1x16x120xf32, #tpu.memory_space<vmem>>, vector<1x16x120xf32>
    %35 = vector.shape_cast %34 : vector<1x16x120xf32> to vector<16x120xf32>
    %36 = vector.shape_cast %33 : vector<16x120xf32> to vector<1x16x120xf32>
    tpu.vector_store %arg3[%c0_19, %c0_20, %c0_21], %36 {strides = array<i32>} : memref<1x16x120xf32, #tpu.memory_space<vmem>>, vector<1x16x120xf32>,
    %c568 = arith.constant 568 : index
    %c0_22 = arith.constant 0 : index
    %37 = vector.load %arg2[%c568, %c0_22] : memref<1648x128xf32, #tpu.memory_space<vmem>>, vector<24x16xf32>
    %cst_23 = arith.constant dense<0.000000e+00> : vector<24x120xf32>
    %38 = tpu.matmul %37, %33, %cst_23 {dimension_numbers = #tpu.dot_dimension_numbers<[1], [0], [0], [1], [0, 0, 1, 1], [], []>} : vector<24x16xf32>, vector<16x120xf32>, vector<24x120xf32> -> vector<24x120xf32>
    %39 = vector.extract_strided_slice %38 {offsets = [0, 0], sizes = [8, 120], strides = [1, 1]} : vector<24x120xf32> to vector<8x120xf32>
    %c600 = arith.constant 600 : index
    %c0_24 = arith.constant 0 : index
    %40 = vector.load %arg2[%c600, %c0_24] : memref<1648x128xf32, #tpu.memory_space<vmem>>, vector<120x112xf32>
    %cst_25 = arith.constant dense<0.000000e+00> : vector<8x112xf32>
    %41 = tpu.matmul %39, %40, %cst_25 {dimension_numbers = #tpu.dot_dimension_numbers<[1], [0], [0], [1], [0, 0, 1, 1], [], []>} : vector<8x120xf32>, vector<120x112xf32>, vector<8x112xf32> -> vector<8x112xf32>
    %42 = vector.extract_strided_slice %38 {offsets = [8, 0], sizes = [8, 120], strides = [1, 1]} : vector<24x120xf32> to vector<8x120xf32>
    %c720 = arith.constant 720 : index
    %c0_26 = arith.constant 0 : index
    %43 = vector.load %arg2[%c720, %c0_26] : memref<1648x128xf32, #tpu.memory_space<vmem>>, vector<120x112xf32>
    %cst_27 = arith.constant dense<0.000000e+00> : vector<8x112xf32>
    %44 = tpu.matmul %42, %43, %cst_27 {dimension_numbers = #tpu.dot_dimension_numbers<[1], [0], [0], [1], [0, 0, 1, 1], [], []>} : vector<8x120xf32>, vector<120x112xf32>, vector<8x112xf32> -> vector<8x112xf32>
    %45 = arith.addf %41, %44 : vector<8x112xf32>
    %46 = vector.extract_strided_slice %38 {offsets = [16, 0], sizes = [8, 120], strides = [1, 1]} : vector<24x120xf32> to vector<8x120xf32>
    %c840 = arith.constant 840 : index
    %c0_28 = arith.constant 0 : index
    %47 = vector.load %arg2[%c840, %c0_28] : memref<1648x128xf32, #tpu.memory_space<vmem>>, vector<120x112xf32>
    %cst_29 = arith.constant dense<0.000000e+00> : vector<8x112xf32>
    %48 = tpu.matmul %46, %47, %cst_29 {dimension_numbers = #tpu.dot_dimension_numbers<[1], [0], [0], [1], [0, 0, 1, 1], [], []>} : vector<8x120xf32>, vector<120x112xf32>, vector<8x112xf32> -> vector<8x112xf32>
    %49 = arith.addf %45, %48 : vector<8x112xf32>
    %c592 = arith.constant 592 : index
    %c0_30 = arith.constant 0 : index
    %50 = vector.load %arg2[%c592, %c0_30] : memref<1648x128xf32, #tpu.memory_space<vmem>>, vector<1x112xf32>
    %51 = vector.broadcast %50 : vector<1x112xf32> to vector<8x112xf32>
    %52 = arith.addf %49, %51 : vector<8x112xf32>
    %c0_31 = arith.constant 0 : index
    %c0_32 = arith.constant 0 : index
    %c0_33 = arith.constant 0 : index
    %53 = vector.load %arg4[%c0_31, %c0_32, %c0_33] : memref<1x8x112xf32, #tpu.memory_space<vmem>>, vector<1x8x112xf32>
    %54 = vector.shape_cast %53 : vector<1x8x112xf32> to vector<8x112xf32>
    %55 = vector.shape_cast %52 : vector<8x112xf32> to vector<1x8x112xf32>
    tpu.vector_store %arg4[%c0_31, %c0_32, %c0_33], %55 {strides = array<i32>} : memref<1x8x112xf32, #tpu.memory_space<vmem>>, vector<1x8x112xf32>,
    %c960 = arith.constant 960 : index
    %c0_34 = arith.constant 0 : index
    %56 = vector.load %arg2[%c960, %c0_34] : memref<1648x128xf32, #tpu.memory_space<vmem>>, vector<24x8xf32>
    %cst_35 = arith.constant dense<0.000000e+00> : vector<24x112xf32>
    %57 = tpu.matmul %56, %52, %cst_35 {dimension_numbers = #tpu.dot_dimension_numbers<[1], [0], [0], [1], [0, 0, 1, 1], [], []>} : vector<24x8xf32>, vector<8x112xf32>, vector<24x112xf32> -> vector<24x112xf32>
    %58 = vector.extract_strided_slice %57 {offsets = [0, 0], sizes = [8, 112], strides = [1, 1]} : vector<24x112xf32> to vector<8x112xf32>
    %c992 = arith.constant 992 : index
    %c0_36 = arith.constant 0 : index
    %59 = vector.load %arg2[%c992, %c0_36] : memref<1648x128xf32, #tpu.memory_space<vmem>>, vector<112x96xf32>
    %cst_37 = arith.constant dense<0.000000e+00> : vector<8x96xf32>
    %60 = tpu.matmul %58, %59, %cst_37 {dimension_numbers = #tpu.dot_dimension_numbers<[1], [0], [0], [1], [0, 0, 1, 1], [], []>} : vector<8x112xf32>, vector<112x96xf32>, vector<8x96xf32> -> vector<8x96xf32>
    %61 = vector.extract_strided_slice %57 {offsets = [8, 0], sizes = [8, 112], strides = [1, 1]} : vector<24x112xf32> to vector<8x112xf32>
    %c1104 = arith.constant 1104 : index
    %c0_38 = arith.constant 0 : index
    %62 = vector.load %arg2[%c1104, %c0_38] : memref<1648x128xf32, #tpu.memory_space<vmem>>, vector<112x96xf32>
    %cst_39 = arith.constant dense<0.000000e+00> : vector<8x96xf32>
    %63 = tpu.matmul %61, %62, %cst_39 {dimension_numbers = #tpu.dot_dimension_numbers<[1], [0], [0], [1], [0, 0, 1, 1], [], []>} : vector<8x112xf32>, vector<112x96xf32>, vector<8x96xf32> -> vector<8x96xf32>
    %64 = arith.addf %60, %63 : vector<8x96xf32>
    %65 = vector.extract_strided_slice %57 {offsets = [16, 0], sizes = [8, 112], strides = [1, 1]} : vector<24x112xf32> to vector<8x112xf32>
    %c1216 = arith.constant 1216 : index
    %c0_40 = arith.constant 0 : index
    %66 = vector.load %arg2[%c1216, %c0_40] : memref<1648x128xf32, #tpu.memory_space<vmem>>, vector<112x96xf32>
    %cst_41 = arith.constant dense<0.000000e+00> : vector<8x96xf32>
    %67 = tpu.matmul %65, %66, %cst_41 {dimension_numbers = #tpu.dot_dimension_numbers<[1], [0], [0], [1], [0, 0, 1, 1], [], []>} : vector<8x112xf32>, vector<112x96xf32>, vector<8x96xf32> -> vector<8x96xf32>
    %68 = arith.addf %64, %67 : vector<8x96xf32>
    %c984 = arith.constant 984 : index
    %c0_42 = arith.constant 0 : index
    %69 = vector.load %arg2[%c984, %c0_42] : memref<1648x128xf32, #tpu.memory_space<vmem>>, vector<1x96xf32>
    %70 = vector.broadcast %69 : vector<1x96xf32> to vector<8x96xf32>
    %71 = arith.addf %68, %70 : vector<8x96xf32>
    %c0_43 = arith.constant 0 : index
    %c0_44 = arith.constant 0 : index
    %c0_45 = arith.constant 0 : index
    %72 = vector.load %arg5[%c0_43, %c0_44, %c0_45] : memref<1x8x96xf32, #tpu.memory_space<vmem>>, vector<1x8x96xf32>
    %73 = vector.shape_cast %72 : vector<1x8x96xf32> to vector<8x96xf32>
    %74 = vector.shape_cast %71 : vector<8x96xf32> to vector<1x8x96xf32>
    tpu.vector_store %arg5[%c0_43, %c0_44, %c0_45], %74 {strides = array<i32>} : memref<1x8x96xf32, #tpu.memory_space<vmem>>, vector<1x8x96xf32>,
    %c1328 = arith.constant 1328 : index
    %c0_46 = arith.constant 0 : index
    %75 = vector.load %arg2[%c1328, %c0_46] : memref<1648x128xf32, #tpu.memory_space<vmem>>, vector<24x8xf32>
    %cst_47 = arith.constant dense<0.000000e+00> : vector<24x96xf32>
    %76 = tpu.matmul %75, %71, %cst_47 {dimension_numbers = #tpu.dot_dimension_numbers<[1], [0], [0], [1], [0, 0, 1, 1], [], []>} : vector<24x8xf32>, vector<8x96xf32>, vector<24x96xf32> -> vector<24x96xf32>
    %77 = vector.extract_strided_slice %76 {offsets = [0, 0], sizes = [8, 96], strides = [1, 1]} : vector<24x96xf32> to vector<8x96xf32>
    %c1360 = arith.constant 1360 : index
    %c0_48 = arith.constant 0 : index
    %78 = vector.load %arg2[%c1360, %c0_48] : memref<1648x128xf32, #tpu.memory_space<vmem>>, vector<96x64xf32>
    %cst_49 = arith.constant dense<0.000000e+00> : vector<8x64xf32>
    %79 = tpu.matmul %77, %78, %cst_49 {dimension_numbers = #tpu.dot_dimension_numbers<[1], [0], [0], [1], [0, 0, 1, 1], [], []>} : vector<8x96xf32>, vector<96x64xf32>, vector<8x64xf32> -> vector<8x64xf32>
    %80 = vector.extract_strided_slice %76 {offsets = [8, 0], sizes = [8, 96], strides = [1, 1]} : vector<24x96xf32> to vector<8x96xf32>
    %c1456 = arith.constant 1456 : index
    %c0_50 = arith.constant 0 : index
    %81 = vector.load %arg2[%c1456, %c0_50] : memref<1648x128xf32, #tpu.memory_space<vmem>>, vector<96x64xf32>
    %cst_51 = arith.constant dense<0.000000e+00> : vector<8x64xf32>
    %82 = tpu.matmul %80, %81, %cst_51 {dimension_numbers = #tpu.dot_dimension_numbers<[1], [0], [0], [1], [0, 0, 1, 1], [], []>} : vector<8x96xf32>, vector<96x64xf32>, vector<8x64xf32> -> vector<8x64xf32>
    %83 = arith.addf %79, %82 : vector<8x64xf32>
    %84 = vector.extract_strided_slice %76 {offsets = [16, 0], sizes = [8, 96], strides = [1, 1]} : vector<24x96xf32> to vector<8x96xf32>
    %c1552 = arith.constant 1552 : index
    %c0_52 = arith.constant 0 : index
    %85 = vector.load %arg2[%c1552, %c0_52] : memref<1648x128xf32, #tpu.memory_space<vmem>>, vector<96x64xf32>
    %cst_53 = arith.constant dense<0.000000e+00> : vector<8x64xf32>
    %86 = tpu.matmul %84, %85, %cst_53 {dimension_numbers = #tpu.dot_dimension_numbers<[1], [0], [0], [1], [0, 0, 1, 1], [], []>} : vector<8x96xf32>, vector<96x64xf32>, vector<8x64xf32> -> vector<8x64xf32>
    %87 = arith.addf %83, %86 : vector<8x64xf32>
    %c1352 = arith.constant 1352 : index
    %c0_54 = arith.constant 0 : index
    %88 = vector.load %arg2[%c1352, %c0_54] : memref<1648x128xf32, #tpu.memory_space<vmem>>, vector<1x64xf32>
    %89 = vector.broadcast %88 : vector<1x64xf32> to vector<8x64xf32>
    %90 = arith.addf %87, %89 : vector<8x64xf32>
    %c0_55 = arith.constant 0 : index
    %c0_56 = arith.constant 0 : index
    %c0_57 = arith.constant 0 : index
    %91 = vector.load %arg6[%c0_55, %c0_56, %c0_57] : memref<1x8x64xf32, #tpu.memory_space<vmem>>, vector<1x8x64xf32>
    %92 = vector.shape_cast %91 : vector<1x8x64xf32> to vector<8x64xf32>
    %93 = vector.shape_cast %90 : vector<8x64xf32> to vector<1x8x64xf32>
    tpu.vector_store %arg6[%c0_55, %c0_56, %c0_57], %93 {strides = array<i32>} : memref<1x8x64xf32, #tpu.memory_space<vmem>>, vector<1x8x64xf32>,
    return
  }
  func.func @transform_0(%arg0: i32) -> (i32, i32, i32) {
    %c0_i32 = arith.constant 0 : i32
    %c0_i32_0 = arith.constant 0 : i32
    %c0_i32_1 = arith.constant 0 : i32
    return %arg0, %c0_i32, %c0_i32_0 : i32, i32, i32
  }
  func.func @transform_1(%arg0: i32) -> (i32, i32) {
    %c0_i32 = arith.constant 0 : i32
    %c0_i32_0 = arith.constant 0 : i32
    %c0_i32_1 = arith.constant 0 : i32
    return %c0_i32, %c0_i32_0 : i32, i32
  }
  func.func @transform_2(%arg0: i32) -> (i32, i32, i32) {
    %c0_i32 = arith.constant 0 : i32
    %c0_i32_0 = arith.constant 0 : i32
    %c0_i32_1 = arith.constant 0 : i32
    return %arg0, %c0_i32, %c0_i32_0 : i32, i32, i32
  }
  func.func @transform_3(%arg0: i32) -> (i32, i32, i32) {
    %c0_i32 = arith.constant 0 : i32
    %c0_i32_0 = arith.constant 0 : i32
    %c0_i32_1 = arith.constant 0 : i32
    return %arg0, %c0_i32, %c0_i32_0 : i32, i32, i32
  }
  func.func @transform_4(%arg0: i32) -> (i32, i32, i32) {
    %c0_i32 = arith.constant 0 : i32
    %c0_i32_0 = arith.constant 0 : i32
    %c0_i32_1 = arith.constant 0 : i32
    return %arg0, %c0_i32, %c0_i32_0 : i32, i32, i32
  }
  func.func @transform_5(%arg0: i32) -> (i32, i32, i32) {
    %c0_i32 = arith.constant 0 : i32
    %c0_i32_0 = arith.constant 0 : i32
    %c0_i32_1 = arith.constant 0 : i32
    return %arg0, %c0_i32, %c0_i32_0 : i32, i32, i32
  }
}

</mosaic_0001>

<bundles_post_ra>
// kernel: tpu_custom_call.1
= control target key start
LH: loop header
LB: loop body
LE: loop exit
PB: predicated region body
PF: predicated region fallthrough
CT: control target
= control target key end

     0   :  { %s4357_s0 = inlined_call_operand.vmem [shape: f32[2,63,63], index: 0, kind: input, shape index: {}]   ;;  %s4358_s1 = inlined_call_operand.hbm [shape: f32[1648,128], index: 1, kind: input, shape index: {}]   ;;  %s4359_s2 = inlined_call_operand.hbm [shape: f32[2,16,120], index: 2, kind: output, shape index: {0}]   ;;  %s4360_s3 = inlined_call_operand.hbm [shape: f32[2,8,112], index: 3, kind: output, shape index: {1}]   ;;  %s4361_s4 = inlined_call_operand.hbm [shape: f32[2,8,96], index: 4, kind: output, shape index: {2}]   ;;  %s4362_s5 = inlined_call_operand.hbm [shape: f32[2,8,64], index: 5, kind: output, shape index: {3}]  }
   0x1   :  { %4368 = sst [smem:[#allocation15_spill]] %s4357_s0 }
   0x2   :  { %4369 = sst [smem:[#allocation16_spill]] %s4358_s1 }
   0x3   :  { %11 = vsyncpa [#allocation3], 0 }
   0x4   :  { %12 = vsyncpa [#allocation4], 0 }
   0x5   :  { %14 = vsyncpa [#allocation4 + $0x1], 0 }
   0x6   :  { %15 = vsyncpa [#allocation7], 0 }
   0x7   :  { %17 = vsyncpa [#allocation7 + $0x1], 0 }
   0x8   :  { %18 = vsyncpa [#allocation10], 0 }
   0x9   :  { %20 = vsyncpa [#allocation10 + $0x1], 0  ;;  %s3895_s18 = smov 0   ;;  %s3897_s19 = smov 0  }
   0xa   :  { %s3899_s20 = smov 0   ;;  %s3901_s21 = smov 0  }
   0xb LB: > { %s3916_s22 = sadd.s32 4294967295, %s3850_s21   ;;  %s4366_s23 = sadd.s32 4294967294, %s3850_s21   ;;  %s3850_s21 = sphi %s3901_s21, %s4388_s21   ;;  %s3846_s20 = sphi %s3899_s20, %s4387_s20   ;;  %s3842_s19 = sphi %s3897_s19, %s4386_s19   ;;  %s3838_s18 = sphi %s3895_s18, %s4385_s18  }
   0xc   : > { %s3920_s24 = sadd.s32 1, %s3850_s21   ;;  %s80_s25 = sadd.s32 1, %s3846_s20 }
   0xd   : > { %s77_s26 = ssub.s32 %s3850_s21, %s3920_s24  ;;  %p90_p0 = scmp.ne.s32.totalorder %s3846_s20, %s3842_s19 }
   0xe   : > { %p78_p1 = scmp.eq.s32.totalorder %s77_s26, 0  ;;  %p91_p2 = scmp.eq.s32.totalorder %s3916_s22, 1 }
   0xf   : > { %p96_p3 = scmp.ne.s32.totalorder %s3842_s19, %s3838_s18  ;;  %p97_p4 = scmp.eq.s32.totalorder %s4366_s23, 1 }
  0x10   : > { %s3933_s27 = scalar_select %p78_p1, %s3846_s20, %s80_s25  }
  0x11   : > { %p3935_p5 = por %p91_p2, %p90_p0  ;;  %p3939_p6 = por %p97_p4, %p96_p3 }
  0x12   : > { %p2455_p7 = scmp.ge.s32.totalorder %s3850_s21, 1  ;;  %p182_p8 = scmp.lt.s32.totalorder %s3850_s21, 3 }
  0x13   : > { %s4370_s28 = scalar_select %p3935_p5, 1, 0 }
  0x14   : > { %s4371_s29 = scalar_select %p3939_p6, 1, 0 }
  0x15   : > { %p4363_p9 = scmp.eq.s32.totalorder %s3916_s22, 0  ;;  %p3946_p10 = pnand %p2455_p7, %p182_p8 }
  0x16   : > { %s3852_s6 = smov [#allocation2]   ;;  %s4374_s1 = sld [smem:[#allocation16_spill]] }
  0x17   : > { %s4372_s30 = scalar_select %p3946_p10, 1, 0 }
  0x18   : > { %s194_s7 = sshll.u32 %s3852_s6, 4  ;;  %p3603_p11 = pneg %p3946_p10  ;;  %s195_s7 = int_to_ptr.vmem [resolvable:$true] %s194_s7 }
  0x1a   : > { %p3954_p12 = pnand %p4363_p9, %p3603_p11 }
  0x1c   : > { %s3664_s11 = scalar_lea.hbm %s4374_s1, 26368  ;;  %p3666_p0 = pneg %p3954_p12 }
  0x1d   : > { %p3665_p13 = scmp.ne.s32.totalorder %s4374_s1, %s3664_s11  ;;  %p3671_p3 = scmp.lt.u32.totalorder %s3664_s11, %s4374_s1 }
  0x1f   : > { %p3667_p1 = pnand %p3666_p0, %p3665_p13 }
  0x21   : > { %p3668_p2 = pneg %p3667_p1 }
  0x23   : > { %p3673_p4 = pnand %p3671_p3, %p3668_p2 }
  0x25   : > { %3676 = shalt.err (!%p3673_p4)
}
  0x26   : > { %s3677_s16 = scalar_lea.vmem %s195_s7, 26368  ;;  %p3685_p9 = scmp.lt.s32.totalorder %s195_s7, %s195_s7 }
  0x27   : > { %p3678_p7 = scmp.ne.s32.totalorder %s195_s7, %s3677_s16  ;;  %p3686_p6 = scmp.lt.s32.totalorder %s3677_s16, %s3677_s16 }
  0x29   : > { %p3680_p8 = pnand %p3678_p7, %p3666_p0  ;;  %p3687_p5 = por %p3686_p6, %p3685_p9 }
  0x2b   : > { %p3681_p11 = pneg %p3680_p8 }
  0x2d   : > { %p3688_p10 = pnand %p3687_p5, %p3681_p11 }
  0x2f   : > { %3691 = shalt.err (!%p3688_p10)
}
  0x30   : > { %s3853_s17 = smov 128   ;;  %s3854_s25 = smov 8  }
  0x31   : > { %3606 = dma.hbm_to_vmem [thread:$0]  (!%p3954_p12), %s4374_s1, 26368, %s195_s7, [#allocation3], %s3853_s17, %s3853_s17, %s3854_s25  }
  0x32   : > { %p4375_p13 = scmp.ne.s32.totalorder %s4372_s30, 0 }
  0x33   : > { %p4376_p1 = scmp.eq.s32.totalorder (!%p4375_p13), %s3916_s22, 0 }
  0x34   : > { %218 = sbr.rel (%p4375_p13) target bundleno = 2044 (0x7fc), region = 28 }
  0x3b   : > { %3821 = dma.done.wait (%p4376_p1), [#allocation3], 26368   ;;  %p4377_p0 = pmov %p4376_p1 }
  0x3c   : > { %p261_p5 = scmp.lt.s32.totalorder %s3916_s22, 1  ;;  %s4378_s0 = sld [smem:[#allocation15_spill]]  ;;  %vm288_vm0 = vcmask 515072   ;;  %v274_v8 = vld [vmem:[#allocation2] sm:$0xff]  ;;  %vm331_vm1 = vcmask 1046528   ;;  %v478_v12 = vld [vmem:[#allocation2 + $0xb8] sm:$0xff] }
  0x3d   : > { %3823 = vsyncadd (%p4377_p0), [#allocation3], 4294940928  ;;  %2790 = vmatprep.mubr.msk.f32.mxu0 %vm288_vm0, %v274_v8  ;;  %v479_v13 = vld [vmem:[#allocation2 + $0xc0] sm:$0xff]  ;;  %v480_v15 = vld [vmem:[#allocation2 + $0xc8] sm:$0xff]  ;;  %vm3855_vm2 = vmmov 1   ;;  %vm3857_vm4 = vmmov 0  }
  0x3e   : > { %s262_s9 = scalar_select %p261_p5, %s3916_s22, 1  ;;  %v3270_v14 = vpack.c.bf16 %v479_v13, %v478_v12  ;;  %v481_v16 = vld [vmem:[#allocation2 + $0xd0] sm:$0xff]  ;;  %v482_v19 = vld [vmem:[#allocation2 + $0xd8] sm:$0xff]  ;;  %v483_v20 = vld [vmem:[#allocation2 + $0xe0] sm:$0xff]  ;;  %vm1131_vm5 = vcmask 982016   ;;  %vm1137_vm6 = vcmask 130048  }
  0x3f   : > { %v3274_v18 = vpack.c.bf16 %v481_v16, %v480_v15  ;;  %vm3986_vm3 = vmpackc.low %vm331_vm1, %vm3855_vm2  ;;  %v3278_v22 = vpack.c.bf16 %v483_v20, %v482_v19  ;;  %v275_v23 = vld [vmem:[#allocation2 + $0x8] sm:$0xff]  ;;  %v276_v24 = vld [vmem:[#allocation2 + $0x10] sm:$0xff]  ;;  %s4081_s30 = sand.u32 1, %s3842_s19   ;;  %vm1498_vm7 = vcmask 916480   ;;  %vm1503_vm8 = vcmask 64512   ;;  %s2224_s25 = sand.u32 1, %s3916_s22  }
  0x40   : > { %s2535_s10 = sshll.u32 %s262_s9, 6  ;;  %3271 = vmatprep.subr.bf16.mxu1 %v3270_v14  ;;  %v277_v25 = vld [vmem:[#allocation2 + $0x18] sm:$0xff]  ;;  %v278_v26 = vld [vmem:[#allocation2 + $0x20] sm:$0xff]  ;;  %v279_v27 = vld [vmem:[#allocation2 + $0x28] sm:$0xff]  ;;  %s2460_s7 = sshll.u32 %s4081_s30, 4  ;;  %vm1861_vm9 = vcmask 785408  }
  0x41   : > { %3273 = vmatpush3.bf16.msra.mxu1 %v3270_v14  ;;  %v280_v28 = vld [vmem:[#allocation2 + $0x30] sm:$0xff]  ;;  %v281_v29 = vld [vmem:[#allocation2 + $0x38] sm:$0xff]  ;;  %v282_v30 = vld [vmem:[#allocation2 + $0x40] sm:$0xff]  ;;  %s4084_s13 = scalar_lea.vmem [#allocation5], %s2460_s7  ;;  %s4133_s14 = sshll.u32 %s4081_s30, 3 }
  0x42   : > { %s265_s12 = scalar_lea.vmem %s4378_s0, %s2535_s10  ;;  %3275 = vmatprep.subr.bf16.mxu1 %v3274_v18  ;;  %v283_v31 = vld [vmem:[#allocation2 + $0x48] sm:$0xff]  ;;  %v284_v32 = vld [vmem:[#allocation2 + $0x50] sm:$0xff]  ;;  %v285_v33 = vld [vmem:[#allocation2 + $0x58] sm:$0xff]  ;;  %s246_s15 = scalar_lea.vmem [#allocation6], %s4133_s14 }
  0x43   : > { %v266_v0 = vld [vmem:[%s265_s12] sm:$0xff]  ;;  %v267_v1 = vld [vmem:[%s265_s12 + $0x8] sm:$0xff]  ;;  %v268_v2 = vld [vmem:[%s265_s12 + $0x10] sm:$0xff]  ;;  %s4367_s16 = scalar_lea.vmem [#allocation8], %s4133_s14  ;;  %s2248_s17 = sshll.u32 %s4084_s13, 4  ;;  %s4209_s17 = int_to_ptr.vmem [resolvable:$true] %s2248_s17 }
  0x44   : > { %v3252_v3 = vpack.c.bf16 %v267_v1, %v266_v0  ;;  %v269_v4 = vld [vmem:[%s265_s12 + $0x18] sm:$0xff]  ;;  %v270_v6 = vld [vmem:[%s265_s12 + $0x20] sm:$0xff]  ;;  %v271_v7 = vld [vmem:[%s265_s12 + $0x28] sm:$0xff]  ;;  %s4213_s26 = sshll.u32 %s3916_s22, 7  ;;  %s2264_s11 = sshll.u32 %s246_s15, 4  ;;  %s4223_s11 = int_to_ptr.vmem [resolvable:$true] %s2264_s11 }
  0x45   : > { %v3256_v5 = vpack.c.bf16 %v269_v4, %v268_v2  ;;  %v3260_v9 = vpack.c.bf16 %v271_v7, %v270_v6  ;;  %v272_v10 = vld [vmem:[%s265_s12 + $0x30] sm:$0xff]  ;;  %v273_v11 = vld [vmem:[%s265_s12 + $0x38] sm:$0x7f]  ;;  %3277 = vmatpush3.bf16.msra.mxu1 %v3274_v18  ;;  %v286_v34 = vld [vmem:[#allocation2 + $0x60] sm:$0xff]  ;;  %s4219_s10 = scalar_lea.hbm %s4360_s3, %s4213_s26  ;;  %s2536_s8 = sshll.u32 %s3916_s22, 8 }
  0x46   : > { %3253 = vmatprep.subr.bf16.mxu0 %v3252_v3  ;;  %v3264_v17 = vpack.c.bf16 %v273_v11, %v272_v10  ;;  %3279 = vmatprep.subr.bf16.mxu1 %v3278_v22  ;;  %v287_v35 = vld [vmem:[#allocation2 + $0x68] sm:$0xff]  ;;  %v485_v37 = vld [vmem:[#allocation2 + $0xf0] sm:$0x7f]  ;;  %v470_v39 = vld [vmem:[#allocation2 + $0x78] sm:$0xff]  ;;  %s4226_s12 = scalar_lea.sflag [#allocation7], %s2224_s25  ;;  %s3692_s7 = scalar_lea.vmem %s4223_s11, 128 }
  0x47   : > { %3255 = vmatpush3.bf16.msra.mxu0 %v3252_v3  ;;  %v484_v36 = vld [vmem:[#allocation2 + $0xe8] sm:$0xff]  ;;  %v471_v40 = vld [vmem:[#allocation2 + $0x80] sm:$0xff]  ;;  %v473_v45 = vld [vmem:[#allocation2 + $0x90] sm:$0xff]  ;;  %p3693_p6 = scmp.ne.s32.totalorder %s4223_s11, %s3692_s7  ;;  %p4381_p9 = scmp.ne.s32.totalorder %s4370_s28, 0 }
  0x48   : > { %3257 = vmatprep.subr.bf16.mxu0 %v3256_v5  ;;  %v3282_v38 = vpack.c.bf16 %v485_v37, %v484_v36  ;;  %v3288_v41 = vpack.c.bf16 %v471_v40, %v470_v39  ;;  %v472_v44 = vld [vmem:[#allocation2 + $0x88] sm:$0xff]  ;;  %v474_v49 = vld [vmem:[#allocation2 + $0x98] sm:$0xff]  ;;  %v475_v50 = vld [vmem:[#allocation2 + $0xa0] sm:$0xff] }
  0x49   : > { %3281 = vmatpush3.bf16.msra.mxu1 %v3278_v22  ;;  %v3292_v48 = vpack.c.bf16 %v473_v45, %v472_v44  ;;  %v3296_v52 = vpack.c.bf16 %v475_v50, %v474_v49  ;;  %v476_v54 = vld [vmem:[#allocation2 + $0xa8] sm:$0xff]  ;;  %v477_v55 = vld [vmem:[#allocation2 + $0xb0] sm:$0x7f]  ;;  %v654_v59 = vld [vmem:[#allocation2 + $0xf8] sm:$0xff]  ;;  %p3694_p10 = pnand %p3693_p6, %p4381_p9 }
  0x4a   : > { %3284 = vmatprep.subr.msk.bf16.mxu1 %vm3986_vm3, %v3282_v38  ;;  %v3300_v57 = vpack.c.bf16 %v477_v55, %v476_v54  ;;  %v655_v60 = vld [vmem:[#allocation2 + $0x100] sm:$0xff]  ;;  %v656_v0 = vld [vmem:[#allocation2 + $0x108] sm:$0xff]  ;;  %v657_v1 = vld [vmem:[#allocation2 + $0x110] sm:$0xff] }
  0x4b   : > { %3259 = vmatpush3.bf16.msra.mxu0 %v3256_v5  ;;  %v3306_v62 = vpack.c.bf16 %v655_v60, %v654_v59  ;;  %v3310_v3 = vpack.c.bf16 %v657_v1, %v656_v0  ;;  %v658_v5 = vld [vmem:[#allocation2 + $0x118] sm:$0xff]  ;;  %v659_v6 = vld [vmem:[#allocation2 + $0x120] sm:$0xff]  ;;  %v660_v10 = vld [vmem:[#allocation2 + $0x128] sm:$0xff]  ;;  %p3695_p12 = pneg %p3694_p10 }
  0x4c   : > { %3261 = vmatprep.subr.bf16.mxu0 %v3260_v9  ;;  %v3314_v8 = vpack.c.bf16 %v659_v6, %v658_v5  ;;  %v661_v11 = vld [vmem:[#allocation2 + $0x130] sm:$0x7f]  ;;  %v748_v13 = vld [vmem:[#allocation2 + $0x138] sm:$0xff]  ;;  %v749_v14 = vld [vmem:[#allocation2 + $0x140] sm:$0xff] }
  0x4d   : > { %3287 = vmatpush3.bf16.msk.msra.mxu1 %vm3986_vm3, %v3282_v38  ;;  %v3318_v12 = vpack.c.bf16 %v661_v11, %v660_v10  ;;  %v3324_v15 = vpack.c.bf16 %v749_v14, %v748_v13  ;;  %v750_v16 = vld [vmem:[#allocation2 + $0x148] sm:$0xff]  ;;  %v752_v19 = vld [vmem:[#allocation2 + $0x158] sm:$0xff]  ;;  %v753_v20 = vld [vmem:[#allocation2 + $0x160] sm:$0xff] }
  0x4e   : > { %3289 = vmatprep.subr.bf16.mxu1 %v3288_v41  ;;  %v3332_v22 = vpack.c.bf16 %v753_v20, %v752_v19  ;;  %v849_v36 = vld [vmem:[#allocation2 + $0x1b0] sm:$0x7f]  ;;  %v936_v38 = vld [vmem:[#allocation2 + $0x1b8] sm:$0xff]  ;;  %v937_v39 = vld [vmem:[#allocation2 + $0x1c0] sm:$0xff] }
  0x4f   : > { %3263 = vmatpush3.bf16.msra.mxu0 %v3260_v9  ;;  %v3360_v40 = vpack.c.bf16 %v937_v39, %v936_v38  ;;  %v940_v44 = vld [vmem:[#allocation2 + $0x1d8] sm:$0xff]  ;;  %v941_v45 = vld [vmem:[#allocation2 + $0x1e0] sm:$0xff]  ;;  %v1033_v54 = vld [vmem:[#allocation2 + $0x210] sm:$0xff] }
  0x50   : > { %3266 = vmatprep.subr.msk.bf16.mxu0 %vm3986_vm3, %v3264_v17  ;;  %v1030_v50 = vld [vmem:[#allocation2 + $0x1f8] sm:$0xff]  ;;  %v1036_v59 = vld [vmem:[#allocation2 + $0x228] sm:$0xff]  ;;  %v1037_v60 = vld [vmem:[#allocation2 + $0x230] sm:$0x7f] }
  0x51   : > { %v1242_v0 = vld [vmem:[#allocation2 + $0x2d0] sm:$0xff]  ;;  %v1243_v1 = vld [vmem:[#allocation2 + $0x2d8] sm:$0xff]  ;;  %v1244_v21 = vld [vmem:[#allocation2 + $0x2e0] sm:$0xff] }
  0x52   : > { %v1246_v5 = vld [vmem:[#allocation2 + $0x2f0] sm:$0xff]  ;;  %v1247_v6 = vld [vmem:[#allocation2 + $0x2f8] sm:$0xff]  ;;  %v1252_v14 = vld [vmem:[#allocation2 + $0x320] sm:$0xff] }
  0x53   : > { %3269 = vmatpush3.bf16.msk.msra.mxu0 %vm3986_vm3, %v3264_v17  ;;  %v751_v17 = vld [vmem:[#allocation2 + $0x150] sm:$0xff] }
  0x54   : > { %v3328_v18 = vpack.c.bf16 %v751_v17, %v750_v16  ;;  %v1250_v11 = vld [vmem:[#allocation2 + $0x310] sm:$0xff] }
  0x55   : > { %v1254_v17 = vld [vmem:[#allocation2 + $0x330] sm:$0xff] }
  0x56   : > { %2791 = vmatmul.mubr.msk.f32.vlgmr.msra.gmra.mrb[0].mxu0 %vm288_vm0, %v275_v23  ;;  %v754_v23 = vld [vmem:[#allocation2 + $0x168] sm:$0xff]  ;;  %v2502_v20 = vld [vmem:[#allocation2 + $0x70] ss:$0 sm:$0xff] }
  0x57   : > { %2793 = vmatprep.mubr.msk.f32.mxu0 %vm288_vm0, %v276_v24  ;;  %v755_v24 = vld [vmem:[#allocation2 + $0x170] sm:$0x7f] }
  0x5a   : > { %2794 = vmatmul.mubr.msk.f32.gmra.mrb[2].mxu0 %vm288_vm0, %v277_v25  ;;  %v3336_v25 = vpack.c.bf16 %v755_v24, %v754_v23 }
  0x5b   : > { %2796 = vmatprep.mubr.msk.f32.mxu0 %vm288_vm0, %v278_v26  ;;  %v842_v26 = vld [vmem:[#allocation2 + $0x178] sm:$0xff] }
  0x5e   : > { %2797 = vmatmul.mubr.msk.f32.gmra.mrb[4].mxu0 %vm288_vm0, %v279_v27  ;;  %v843_v27 = vld [vmem:[#allocation2 + $0x180] sm:$0xff] }
  0x5f   : > { %2799 = vmatprep.mubr.msk.f32.mxu0 %vm288_vm0, %v280_v28  ;;  %v3342_v28 = vpack.c.bf16 %v843_v27, %v842_v26  ;;  %v1134_v27 = vld [vmem:[#allocation2 + $0x238] sm:$0xff] }
  0x62   : > { %2800 = vmatmul.mubr.msk.f32.gmra.mrb[6].mxu0 %vm288_vm0, %v281_v29  ;;  %v844_v29 = vld [vmem:[#allocation2 + $0x188] sm:$0xff] }
  0x63   : > { %2802 = vmatprep.mubr.msk.f32.mxu0 %vm288_vm0, %v282_v30  ;;  %v845_v30 = vld [vmem:[#allocation2 + $0x190] sm:$0xff] }
  0x66   : > { %2803 = vmatmul.mubr.msk.f32.gmra.mrb[8].mxu0 %vm288_vm0, %v283_v31  ;;  %v3346_v31 = vpack.c.bf16 %v845_v30, %v844_v29  ;;  %v1136_v29 = vld [vmem:[#allocation2 + $0x248] sm:$0xff]  ;;  %v1256_v30 = vld [vmem:[#allocation2 + $0x340] sm:$0xff] }
  0x67   : > { %2805 = vmatprep.mubr.msk.f32.mxu0 %vm288_vm0, %v284_v32  ;;  %v846_v32 = vld [vmem:[#allocation2 + $0x198] sm:$0xff] }
  0x6a   : > { %2806 = vmatmul.mubr.msk.f32.gmra.mrb[10].mxu0 %vm288_vm0, %v285_v33  ;;  %v847_v33 = vld [vmem:[#allocation2 + $0x1a0] sm:$0xff] }
  0x6b   : > { %2808 = vmatprep.mubr.msk.f32.mxu0 %vm288_vm0, %v286_v34  ;;  %v3350_v34 = vpack.c.bf16 %v847_v33, %v846_v32  ;;  %v1228_v32 = vld [vmem:[#allocation2 + $0x260] sm:$0xff] }
  0x6e   : > { %2809 = vmatmul.mubr.msk.f32.gmra.mrb[12].mxu0 %vm288_vm0, %v287_v35  ;;  %v848_v35 = vld [vmem:[#allocation2 + $0x1a8] sm:$0xff] }
  0x6f   : > { %v3354_v37 = vpack.c.bf16 %v849_v36, %v848_v35  ;;  %v1229_v36 = vld [vmem:[#allocation2 + $0x268] sm:$0xff] }
 0x129   : > { %v2792_v42 = vpop.f32.mrb[0].mxu0 }
 0x12a   : > { %v401_v43 = vpop.f32.mrb[1].mxu0 }
 0x12d   : > { %v2795_v46 = vpop.f32.mrb[2].mxu0 }
 0x12e   : > { %v411_v47 = vpop.f32.mrb[3].mxu0 }
 0x12f   : > { %2827 = vmatprep.mubr.msk.f32.mxu1 %vm288_vm0, %v411_v47  ;;  %v942_v47 = vld [vmem:[#allocation2 + $0x1e8] sm:$0xff] }
 0x130   : > { %2828 = vmatmul.mubr.msk.f32.vlgmr.msra.gmra.mrb[0].mxu1 %vm288_vm0, %v2795_v46  ;;  %v3368_v46 = vpack.c.bf16 %v941_v45, %v940_v44 }
 0x131   : > { %3291 = vmatpush3.bf16.msra.mxu1 %v3288_v41  ;;  %2846 = vmatprep.mubr.msk.f32.mxu1 %vm288_vm0, %v401_v43  ;;  %v2798_v51 = vpop.f32.mrb[4].mxu0  ;;  %v938_v41 = vld [vmem:[#allocation2 + $0x1c8] sm:$0xff] }
 0x132   : > { %3293 = vmatprep.subr.bf16.mxu1 %v3292_v48  ;;  %v421_v53 = vpop.f32.mrb[5].mxu0 }
 0x135   : > { %3295 = vmatpush3.bf16.msra.mxu1 %v3292_v48  ;;  %v4014_v56 = vpop.f32.mrb[6].mxu0  ;;  %v943_v48 = vld [vmem:[#allocation2 + $0x1f0] sm:$0x7f] }
 0x136   : > { %3297 = vmatprep.subr.bf16.mxu1 %v3296_v52  ;;  %v431_v58 = vpop.f32.mrb[7].mxu0  ;;  %v3372_v49 = vpack.c.bf16 %v943_v48, %v942_v47  ;;  %v1234_v47 = vld [vmem:[#allocation2 + $0x290] sm:$0xff] }
 0x139   : > { %3299 = vmatpush3.bf16.msra.mxu1 %v3296_v52  ;;  %v4016_v61 = vpop.f32.mrb[8].mxu0 }
 0x13a   : > { %3302 = vmatprep.subr.msk.bf16.mxu1 %vm3986_vm3, %v3300_v57  ;;  %v441_v63 = vpop.f32.mrb[9].mxu0 }
 0x13d   : > { %3305 = vmatpush3.bf16.msk.msra.mxu1 %vm3986_vm3, %v3300_v57  ;;  %v4022_v2 = vpop.f32.mrb[10].mxu0  ;;  %v1035_v57 = vld [vmem:[#allocation2 + $0x220] sm:$0xff] }
 0x13e   : > { %3307 = vmatprep.subr.bf16.mxu1 %v3306_v62  ;;  %v4024_v4 = vpop.f32.mrb[11].mxu0 }
 0x140   : > { %2847 = vmatmul.mubr.msk.f32.vlgmr.msra.gmra.mrb[0].mxu1 %vm288_vm0, %v2792_v42  ;;  %v939_v42 = vld [vmem:[#allocation2 + $0x1d0] sm:$0xff] }
 0x141   : > { %3309 = vmatpush3.bf16.msra.mxu1 %v3306_v62  ;;  %2865 = vmatprep.mubr.msk.f32.mxu1 %vm288_vm0, %v421_v53  ;;  %v4028_v7 = vpop.f32.mrb[12].mxu0  ;;  %v3364_v43 = vpack.c.bf16 %v939_v42, %v938_v41  ;;  %v1032_v53 = vld [vmem:[#allocation2 + $0x208] sm:$0xff]  ;;  %v3856_v62 = vmov 0.0|0.0   ;;  %v1231_v41 = vld [vmem:[#allocation2 + $0x278] sm:$0xff]  ;;  %v1232_v42 = vld [vmem:[#allocation2 + $0x280] sm:$0xff] }
 0x142   : > { %3311 = vmatprep.subr.bf16.mxu1 %v3310_v3  ;;  %v4030_v9 = vpop.f32.mrb[13].mxu0  ;;  %v3382_v55 = vpack.c.bf16 %v1033_v54, %v1032_v53  ;;  %3399 = vmatprep.subr.bf16.mxu0 %v3856_v62  ;;  %v3427_v45 = vpack.c.bf16 %v1232_v42, %v1231_v41  ;;  %v1238_v53 = vld [vmem:[#allocation2 + $0x2b0] sm:$0xff] }
 0x145   : > { %3313 = vmatpush3.bf16.msra.mxu1 %v3310_v3  ;;  %v1245_v3 = vld [vmem:[#allocation2 + $0x2e8] sm:$0xff] }
 0x146   : > { %3315 = vmatprep.subr.bf16.mxu1 %v3314_v8 }
 0x149   : > { %3317 = vmatpush3.bf16.msra.mxu1 %v3314_v8  ;;  %v1248_v8 = vld [vmem:[#allocation2 + $0x300] sm:$0xff] }
 0x14a   : > { %3320 = vmatprep.subr.msk.bf16.mxu1 %vm3986_vm3, %v3318_v12 }
 0x14d   : > { %3323 = vmatpush3.bf16.msk.msra.mxu1 %vm3986_vm3, %v3318_v12  ;;  %v1251_v12 = vld [vmem:[#allocation2 + $0x318] sm:$0xff] }
 0x14e   : > { %3325 = vmatprep.subr.bf16.mxu1 %v3324_v15  ;;  %v3412_v13 = vpack.c.bf16 %v1251_v12, %v1250_v11  ;;  %v1413_v11 = vld [vmem:[#allocation2 + $0x398] sm:$0xff]  ;;  %v1414_v12 = vld [vmem:[#allocation2 + $0x3a0] sm:$0xff] }
 0x150   : > { %2866 = vmatmul.mubr.msk.f32.vlgmr.msra.gmra.mrb[0].mxu1 %vm288_vm0, %v2798_v51  ;;  %v1031_v51 = vld [vmem:[#allocation2 + $0x200] sm:$0xff] }
 0x151   : > { %3327 = vmatpush3.bf16.msra.mxu1 %v3324_v15  ;;  %2884 = vmatprep.mubr.msk.f32.mxu1 %vm288_vm0, %v431_v58  ;;  %v3378_v52 = vpack.c.bf16 %v1031_v51, %v1030_v50  ;;  %v1253_v15 = vld [vmem:[#allocation2 + $0x328] sm:$0xff]  ;;  %v1236_v50 = vld [vmem:[#allocation2 + $0x2a0] sm:$0xff] }
 0x152   : > { %3329 = vmatprep.subr.bf16.mxu1 %v3328_v18  ;;  %v3415_v16 = vpack.c.bf16 %v1253_v15, %v1252_v14  ;;  %v1415_v14 = vld [vmem:[#allocation2 + $0x3a8] sm:$0xff]  ;;  %v1416_v15 = vld [vmem:[#allocation2 + $0x3b0] sm:$0xff] }
 0x155   : > { %3331 = vmatpush3.bf16.msra.mxu1 %v3328_v18  ;;  %v1255_v18 = vld [vmem:[#allocation2 + $0x338] sm:$0xff] }
 0x156   : > { %3333 = vmatprep.subr.bf16.mxu1 %v3332_v22  ;;  %v3418_v19 = vpack.c.bf16 %v1255_v18, %v1254_v17  ;;  %v1417_v17 = vld [vmem:[#allocation2 + $0x3b8] sm:$0xff]  ;;  %v1607_v18 = vld [vmem:[#allocation2 + $0x450] sm:$0xff] }
 0x159   : > { %3335 = vmatpush3.bf16.msra.mxu1 %v3332_v22 }
 0x15a   : > { %3338 = vmatprep.subr.msk.bf16.mxu1 %vm3986_vm3, %v3336_v25 }
 0x15d   : > { %3341 = vmatpush3.bf16.msk.msra.mxu1 %vm3986_vm3, %v3336_v25 }
 0x15e   : > { %3343 = vmatprep.subr.bf16.mxu1 %v3342_v28 }
 0x160   : > { %2885 = vmatmul.mubr.msk.f32.vlgmr.msra.gmra.mrb[0].mxu1 %vm288_vm0, %v4014_v56  ;;  %v1034_v56 = vld [vmem:[#allocation2 + $0x218] sm:$0xff] }
 0x161   : > { %3345 = vmatpush3.bf16.msra.mxu1 %v3342_v28  ;;  %2903 = vmatprep.mubr.msk.f32.mxu1 %vm288_vm0, %v441_v63  ;;  %v3386_v58 = vpack.c.bf16 %v1035_v57, %v1034_v56  ;;  %v3858_v63 = vmov 0.0   ;;  %v1135_v28 = vld [vmem:[#allocation2 + $0x240] sm:$0xff] }
 0x162   : > { %3347 = vmatprep.subr.bf16.mxu1 %v3346_v31  ;;  %2987 = vmatprep.mubr.msk.f32.mxu0 %vm3857_vm4, %v3858_v63  ;;  %v1240_v56 = vld [vmem:[#allocation2 + $0x2c0] sm:$0xff] }
 0x165   : > { %3349 = vmatpush3.bf16.msra.mxu1 %v3346_v31  ;;  %v1227_v31 = vld [vmem:[#allocation2 + $0x258] sm:$0xff] }
 0x166   : > { %3351 = vmatprep.subr.bf16.mxu1 %v3350_v34  ;;  %v3421_v35 = vpack.c.bf16 %v1228_v32, %v1227_v31  ;;  %v1615_v31 = vld [vmem:[#allocation2 + $0x490] sm:$0xff]  ;;  %v1616_v32 = vld [vmem:[#allocation2 + $0x498] sm:$0xff] }
 0x169   : > { %3353 = vmatpush3.bf16.msra.mxu1 %v3350_v34 }
 0x16a   : > { %3356 = vmatprep.subr.msk.bf16.mxu1 %vm3986_vm3, %v3354_v37 }
 0x16d   : > { %3359 = vmatpush3.bf16.msk.msra.mxu1 %vm3986_vm3, %v3354_v37  ;;  %v1230_v37 = vld [vmem:[#allocation2 + $0x270] sm:$0xff] }
 0x16e   : > { %3361 = vmatprep.subr.bf16.mxu1 %v3360_v40 }
 0x170   : > { %2904 = vmatmul.mubr.msk.f32.vlgmr.msra.gmra.mrb[0].mxu1 %vm288_vm0, %v4016_v61  ;;  %v3390_v61 = vpack.c.bf16 %v1037_v60, %v1036_v59  ;;  %v1404_v59 = vld [vmem:[#allocation2 + $0x350] sm:$0xff]  ;;  %v1241_v60 = vld [vmem:[#allocation2 + $0x2c8] sm:$0xff] }
 0x171   : > { %3363 = vmatpush3.bf16.msra.mxu1 %v3360_v40  ;;  %2922 = vmatprep.mubr.msk.f32.mxu1 %vm288_vm0, %v4024_v4  ;;  %v3403_v4 = vpack.c.bf16 %v1245_v3, %v1244_v21  ;;  %v3424_v40 = vpack.c.bf16 %v1230_v37, %v1229_v36  ;;  %v1408_v3 = vld [vmem:[#allocation2 + $0x370] sm:$0xff] }
 0x172   : > { %3365 = vmatprep.subr.bf16.mxu1 %v3364_v43 }
 0x175   : > { %3367 = vmatpush3.bf16.msra.mxu1 %v3364_v43 }
 0x176   : > { %3369 = vmatprep.subr.bf16.mxu1 %v3368_v46 }
 0x179   : > { %3371 = vmatpush3.bf16.msra.mxu1 %v3368_v46  ;;  %v1233_v46 = vld [vmem:[#allocation2 + $0x288] sm:$0xff] }
 0x17a   : > { %3374 = vmatprep.subr.msk.bf16.mxu1 %vm3986_vm3, %v3372_v49  ;;  %v3430_v48 = vpack.c.bf16 %v1234_v47, %v1233_v46 }
 0x17d   : > { %3377 = vmatpush3.bf16.msk.msra.mxu1 %vm3986_vm3, %v3372_v49  ;;  %v1235_v49 = vld [vmem:[#allocation2 + $0x298] sm:$0xff] }
 0x17e   : > { %3379 = vmatprep.subr.bf16.mxu1 %v3378_v52  ;;  %v3433_v51 = vpack.c.bf16 %v1236_v50, %v1235_v49  ;;  %v1500_v49 = vld [vmem:[#allocation2 + $0x3c0] sm:$0xff] }
 0x180   : > { %2923 = vmatmul.mubr.msk.f32.vlgmr.msra.gmra.mrb[0].mxu1 %vm288_vm0, %v4022_v2  ;;  %v3400_v2 = vpack.c.bf16 %v1243_v1, %v1242_v0  ;;  %v1405_v0 = vld [vmem:[#allocation2 + $0x358] sm:$0xff]  ;;  %v1406_v1 = vld [vmem:[#allocation2 + $0x360] sm:$0xff] }
 0x181   : > { %3381 = vmatpush3.bf16.msra.mxu1 %v3378_v52  ;;  %2941 = vmatprep.mubr.msk.f32.mxu1 %vm288_vm0, %v4030_v9  ;;  %v1249_v9 = vld [vmem:[#allocation2 + $0x308] sm:$0xff]  ;;  %v3445_v21 = vpack.c.bf16 %v1406_v1, %v1405_v0  ;;  %v1601_v0 = vld [vmem:[#allocation2 + $0x420] sm:$0xff] }
 0x182   : > { %3383 = vmatprep.subr.bf16.mxu1 %v3382_v55  ;;  %3401 = vmatpush3.bf16.msra.mxu0 %v3400_v2  ;;  %v3409_v10 = vpack.c.bf16 %v1249_v9, %v1248_v8  ;;  %v1237_v52 = vld [vmem:[#allocation2 + $0x2a8] sm:$0xff]  ;;  %v1412_v9 = vld [vmem:[#allocation2 + $0x390] sm:$0xff] }
 0x183   : > { %3402 = vmatprep.subr.bf16.mxu0 %v3856_v62  ;;  %v3436_v54 = vpack.c.bf16 %v1238_v53, %v1237_v52  ;;  %v1407_v2 = vld [vmem:[#allocation2 + $0x368] sm:$0xff]  ;;  %v1596_v52 = vld [vmem:[#allocation2 + $0x3f8] sm:$0xff] }
 0x184   : > { %v1411_v8 = vld [vmem:[#allocation2 + $0x388] sm:$0xff] }
 0x185   : > { %3385 = vmatpush3.bf16.msra.mxu1 %v3382_v55  ;;  %v1239_v55 = vld [vmem:[#allocation2 + $0x2b8] sm:$0xff]  ;;  %v1501_v53 = vld [vmem:[#allocation2 + $0x3c8] sm:$0xff] }
 0x186   : > { %3387 = vmatprep.subr.bf16.mxu1 %v3386_v58  ;;  %3404 = vmatpush3.bf16.msra.mxu0 %v3403_v4  ;;  %v3439_v57 = vpack.c.bf16 %v1240_v56, %v1239_v55  ;;  %v3448_v4 = vpack.c.bf16 %v1408_v3, %v1407_v2  ;;  %v1597_v55 = vld [vmem:[#allocation2 + $0x400] sm:$0xff]  ;;  %v1598_v56 = vld [vmem:[#allocation2 + $0x408] sm:$0xff]  ;;  %v1603_v2 = vld [vmem:[#allocation2 + $0x430] sm:$0xff] }
 0x187   : > { %3405 = vmatprep.subr.bf16.mxu0 %v3856_v62  ;;  %v1602_v1 = vld [vmem:[#allocation2 + $0x428] sm:$0xff]  ;;  %v1604_v3 = vld [vmem:[#allocation2 + $0x438] sm:$0xff] }
 0x189   : > { %3389 = vmatpush3.bf16.msra.mxu1 %v3386_v58  ;;  %v1403_v58 = vld [vmem:[#allocation2 + $0x348] sm:$0xff] }
 0x18a   : > { %3392 = vmatprep.subr.msk.bf16.mxu1 %vm3986_vm3, %v3390_v61 }
 0x18d   : > { %3395 = vmatpush3.bf16.msk.msra.mxu1 %vm3986_vm3, %v3390_v61  ;;  %v3442_v61 = vpack.c.bf16 %v1404_v59, %v1403_v58  ;;  %v3490_v58 = vpack.c.bf16 %v1598_v56, %v1597_v55  ;;  %v1599_v59 = vld [vmem:[#allocation2 + $0x410] sm:$0xff]  ;;  %v1966_v55 = vld [vmem:[#allocation2 + $0x5a8] sm:$0xff] }
 0x18e   : > { %3396 = vmatprep.subr.bf16.mxu1 %v3856_v62 }
 0x190   : > { %2942 = vmatmul.mubr.msk.f32.vlgmr.msra.gmra.mrb[0].mxu1 %vm288_vm0, %v4028_v7  ;;  %v3406_v7 = vpack.c.bf16 %v1247_v6, %v1246_v5  ;;  %v1409_v5 = vld [vmem:[#allocation2 + $0x378] sm:$0xff]  ;;  %v1410_v6 = vld [vmem:[#allocation2 + $0x380] sm:$0xff] }
 0x191   : > { %2948 = vmatprep.mubr.msk.f32.mxu1 %vm3857_vm4, %v3858_v63 }
 0x192   : > { %3407 = vmatpush3.bf16.msra.mxu0 %v3406_v7  ;;  %v3451_v7 = vpack.c.bf16 %v1410_v6, %v1409_v5  ;;  %v1605_v5 = vld [vmem:[#allocation2 + $0x440] sm:$0xff]  ;;  %v1606_v6 = vld [vmem:[#allocation2 + $0x448] sm:$0xff] }
 0x193   : > { %3408 = vmatprep.subr.bf16.mxu0 %v3856_v62 }
 0x196   : > { %3410 = vmatpush3.bf16.msra.mxu0 %v3409_v10  ;;  %v3454_v10 = vpack.c.bf16 %v1412_v9, %v1411_v8  ;;  %v1619_v8 = vld [vmem:[#allocation2 + $0x4b0] sm:$0xff]  ;;  %v1620_v9 = vld [vmem:[#allocation2 + $0x4b8] sm:$0xff] }
 0x197   : > { %3411 = vmatprep.subr.bf16.mxu0 %v3856_v62 }
 0x19a   : > { %3413 = vmatpush3.bf16.msra.mxu0 %v3412_v13  ;;  %v3457_v13 = vpack.c.bf16 %v1414_v12, %v1413_v11  ;;  %v1767_v11 = vld [vmem:[#allocation2 + $0x4c0] sm:$0xff]  ;;  %v1768_v12 = vld [vmem:[#allocation2 + $0x4c8] sm:$0xff] }
 0x19b   : > { %3414 = vmatprep.subr.bf16.mxu0 %v3856_v62 }
 0x19e   : > { %3416 = vmatpush3.bf16.msra.mxu0 %v3415_v16  ;;  %v3460_v16 = vpack.c.bf16 %v1416_v15, %v1415_v14  ;;  %v3505_v15 = vpack.c.bf16 %v1768_v12, %v1767_v11  ;;  %v1971_v12 = vld [vmem:[#allocation2 + $0x5d0] sm:$0xff] }
 0x19f   : > { %3417 = vmatprep.subr.bf16.mxu0 %v3856_v62 }
 0x1a2   : > { %3419 = vmatpush3.bf16.msra.mxu0 %v3418_v19  ;;  %v1608_v19 = vld [vmem:[#allocation2 + $0x458] sm:$0xff] }
 0x1a3   : > { %2985 = vmatprep.subr.mxu0 %v3858_v63 }
 0x1a6   : > { %2986 = vmatpush3.msra.mxu0 %v1256_v30 }
 0x1a7   : > { %3420 = vmatprep.subr.bf16.mxu0 %v3856_v62 }
 0x263   : > { %v2943_v22 = vpop.f32.mrb[0].mxu1 }
 0x264   : > { %v1130_v23 = vadd.f32 %v2943_v22, %v2502_v20  ;;  %v1113_v24 = vpop.f32.mrb[1].mxu1  ;;  %v1609_v22 = vld [vmem:[#allocation2 + $0x460] sm:$0xff] }
 0x265   : > { %v1129_v25 = vadd.f32 %v2502_v20, %v1113_v24  ;;  %v3463_v20 = vpack.c.bf16 %v1608_v19, %v1607_v18 }
 0x266   : > { %1133 = vst.msk [vmem:[%s4084_s13 + $0x8] sm:$0xff] %vm1131_vm5, %v1130_v23 }
 0x267   : > { %1132 = vst.msk [vmem:[%s4084_s13] sm:$0xff] %vm1131_vm5, %v1129_v25  ;;  %v3397_v26 = vpack.c.bf16 %v1130_v23, %v1129_v25  ;;  %v1610_v23 = vld [vmem:[#allocation2 + $0x468] sm:$0xff]  ;;  %v1611_v25 = vld [vmem:[#allocation2 + $0x470] sm:$0xff]  ;;  %s3859_s13 = smov [#allocation6]  }
 0x268   : > { %v3466_v24 = vpack.c.bf16 %v1610_v23, %v1609_v22  ;;  %v1771_v22 = vld [vmem:[#allocation2 + $0x4e0] sm:$0xff]  ;;  %v1772_v23 = vld [vmem:[#allocation2 + $0x4e8] sm:$0xff]  ;;  %s3696_s23 = sshll.u32 %s3859_s13, 4  ;;  %s3697_s23 = int_to_ptr.vmem [resolvable:$false] %s3696_s23 }
 0x269   : > { %3398 = vmatpush3.bf16.msra.mxu1 %v3397_v26  ;;  %v1612_v26 = vld [vmem:[#allocation2 + $0x478] sm:$0xff]  ;;  %s3698_s6 = scalar_lea.vmem %s3697_s23, 256  ;;  %p3699_p2 = scmp.lt.s32.totalorder %s4223_s11, %s3697_s23 }
 0x26a   : > { %3462 = vmatprep.subr.bf16.mxu1 %v3856_v62  ;;  %p3700_p3 = scmp.lt.s32.totalorder %s3698_s6, %s3692_s7 }
 0x26c   : > { %2949 = vmatmul.mubr.msk.f32.vlgmr.msra.gmra.mrb[2].mxu1 %vm1137_vm6, %v1134_v27  ;;  %v3469_v27 = vpack.c.bf16 %v1612_v26, %v1611_v25  ;;  %v3511_v26 = vpack.c.bf16 %v1772_v23, %v1771_v22  ;;  %v1977_v23 = vld [vmem:[#allocation2 + $0x600] sm:$0xff]  ;;  %p3701_p4 = por %p3700_p3, %p3699_p2 }
 0x26d   : > { %2951 = vmatprep.mubr.msk.f32.mxu1 %vm3857_vm4, %v3858_v63  ;;  %3464 = vmatpush3.bf16.msra.mxu1 %v3463_v20 }
 0x26e   : > { %3465 = vmatprep.subr.bf16.mxu1 %v3856_v62  ;;  %p3702_p7 = pnand %p3701_p4, %p3695_p12 }
 0x270   : > { %2952 = vmatmul.mubr.msk.f32.gmra.mrb[4].mxu1 %vm1137_vm6, %v1135_v28  ;;  %v1613_v28 = vld [vmem:[#allocation2 + $0x480] sm:$0xff] }
 0x271   : > { %2954 = vmatprep.mubr.msk.f32.mxu1 %vm3857_vm4, %v3858_v63  ;;  %3467 = vmatpush3.bf16.msra.mxu1 %v3466_v24 }
 0x272   : > { %3468 = vmatprep.subr.bf16.mxu1 %v3856_v62 }
 0x274   : > { %2955 = vmatmul.mubr.msk.f32.gmra.mrb[6].mxu1 %vm1137_vm6, %v1136_v29  ;;  %v1614_v29 = vld [vmem:[#allocation2 + $0x488] sm:$0xff] }
 0x275   : > { %3095 = vmatprep.mubr.msk.f32.mxu1 %vm3857_vm4, %v3858_v63  ;;  %3470 = vmatpush3.bf16.msra.mxu1 %v3469_v27  ;;  %v3472_v30 = vpack.c.bf16 %v1614_v29, %v1613_v28  ;;  %v1773_v27 = vld [vmem:[#allocation2 + $0x4f0] sm:$0xff]  ;;  %v1774_v28 = vld [vmem:[#allocation2 + $0x4f8] sm:$0xff] }
 0x276   : > { %3471 = vmatprep.subr.bf16.mxu1 %v3856_v62  ;;  %v3514_v29 = vpack.c.bf16 %v1774_v28, %v1773_v27  ;;  %v2126_v27 = vld [vmem:[#allocation2 + $0x618] sm:$0xff] }
 0x279   : > { %3473 = vmatpush3.bf16.msra.mxu1 %v3472_v30  ;;  %v1775_v30 = vld [vmem:[#allocation2 + $0x500] sm:$0xff] }
 0x27a   : > { %3474 = vmatprep.subr.bf16.mxu1 %v3856_v62 }
 0x33f   : > { %v1213_v33 = vpop.f32.mrb[2].mxu1 }
 0x340   : > { %v2950_v34 = vpop.f32.mrb[3].mxu1 }
 0x341   : > { %v1617_v34 = vld [vmem:[#allocation2 + $0x4a0] sm:$0xff] }
 0x343   : > { %v1218_v38 = vpop.f32.mrb[4].mxu1 }
 0x344   : > { %v2953_v39 = vpop.f32.mrb[5].mxu1  ;;  %2988 = vmatmul.mubr.msk.f32.vlgmr.msra.gmra.mrb[14].mxu0 %vm1131_vm5, %v1218_v38 }
 0x345   : > { %3422 = vmatpush3.bf16.msra.mxu0 %v3421_v35  ;;  %3020 = vmatprep.mubr.msk.f32.mxu0 %vm3857_vm4, %v3858_v63  ;;  %v1618_v35 = vld [vmem:[#allocation2 + $0x4a8] sm:$0xff] }
 0x346   : > { %3423 = vmatprep.subr.bf16.mxu0 %v3856_v62  ;;  %v3478_v36 = vpack.c.bf16 %v1618_v35, %v1617_v34  ;;  %v1778_v34 = vld [vmem:[#allocation2 + $0x518] sm:$0xff] }
 0x347   : > { %v4102_v43 = vpop.f32.mrb[6].mxu1 }
 0x348   : > { %v2956_v44 = vpop.f32.mrb[7].mxu1 }
 0x349   : > { %3425 = vmatpush3.bf16.msra.mxu0 %v3424_v40  ;;  %v1593_v44 = vld [vmem:[#allocation2 + $0x3e0] sm:$0xff] }
 0x34a   : > { %3426 = vmatprep.subr.bf16.mxu0 %v3856_v62 }
 0x34d   : > { %3428 = vmatpush3.bf16.msra.mxu0 %v3427_v45  ;;  %v1594_v45 = vld [vmem:[#allocation2 + $0x3e8] sm:$0xff] }
 0x34e   : > { %3429 = vmatprep.subr.bf16.mxu0 %v3856_v62  ;;  %v3484_v50 = vpack.c.bf16 %v1594_v45, %v1593_v44  ;;  %v1959_v45 = vld [vmem:[#allocation2 + $0x570] sm:$0xff] }
 0x351   : > { %3431 = vmatpush3.bf16.msra.mxu0 %v3430_v48 }
 0x352   : > { %3432 = vmatprep.subr.bf16.mxu0 %v3856_v62 }
 0x355   : > { %3434 = vmatpush3.bf16.msra.mxu0 %v3433_v51  ;;  %v1595_v51 = vld [vmem:[#allocation2 + $0x3f0] sm:$0xff] }
 0x356   : > { %3435 = vmatprep.subr.bf16.mxu0 %v3856_v62 }
 0x359   : > { %3437 = vmatpush3.bf16.msra.mxu0 %v3436_v54  ;;  %v3487_v54 = vpack.c.bf16 %v1596_v52, %v1595_v51  ;;  %v1963_v51 = vld [vmem:[#allocation2 + $0x590] sm:$0xff]  ;;  %v1964_v52 = vld [vmem:[#allocation2 + $0x598] sm:$0xff] }
 0x35a   : > { %3438 = vmatprep.subr.bf16.mxu0 %v3856_v62 }
 0x35d   : > { %3440 = vmatpush3.bf16.msra.mxu0 %v3439_v57  ;;  %v1502_v57 = vld [vmem:[#allocation2 + $0x3d0] sm:$0xff] }
 0x35e   : > { %3018 = vmatprep.subr.mxu0 %v3858_v63 }
 0x361   : > { %3019 = vmatpush3.msra.mxu0 %v1241_v60  ;;  %v1600_v60 = vld [vmem:[#allocation2 + $0x418] sm:$0xff] }
 0x362   : > { %3021 = vmatmul.mubr.msk.f32.vlgmr.msra.gmra.mrb[16].mxu0 %vm1131_vm5, %v1213_v33  ;;  %3441 = vmatprep.subr.bf16.mxu0 %v3856_v62  ;;  %v3475_v33 = vpack.c.bf16 %v1616_v32, %v1615_v31  ;;  %v1776_v31 = vld [vmem:[#allocation2 + $0x508] sm:$0xff] }
 0x363   : > { %3443 = vmatpush3.bf16.msra.mxu0 %v3442_v61  ;;  %3053 = vmatprep.mubr.msk.f32.mxu0 %vm3857_vm4, %v3858_v63  ;;  %v3493_v61 = vpack.c.bf16 %v1600_v60, %v1599_v59  ;;  %v3517_v32 = vpack.c.bf16 %v1776_v31, %v1775_v30  ;;  %v2127_v31 = vld [vmem:[#allocation2 + $0x620] sm:$0xff] }
 0x364   : > { %3444 = vmatprep.subr.bf16.mxu0 %v3856_v62  ;;  %3476 = vmatpush3.bf16.msra.mxu1 %v3475_v33  ;;  %v1777_v33 = vld [vmem:[#allocation2 + $0x510] sm:$0xff] }
 0x365   : > { %3477 = vmatprep.subr.bf16.mxu1 %v3856_v62  ;;  %v3520_v35 = vpack.c.bf16 %v1778_v34, %v1777_v33 }
 0x367   : > { %3446 = vmatpush3.bf16.msra.mxu0 %v3445_v21  ;;  %v3496_v21 = vpack.c.bf16 %v1602_v1, %v1601_v0  ;;  %v2516_v1 = vld [vmem:[#allocation2 + $0x3d8] ss:$0 sm:$0xff] }
 0x368   : > { %3447 = vmatprep.subr.bf16.mxu0 %v3856_v62  ;;  %3479 = vmatpush3.bf16.msra.mxu1 %v3478_v36  ;;  %v1779_v36 = vld [vmem:[#allocation2 + $0x520] sm:$0xff] }
 0x369   : > { %3480 = vmatprep.subr.bf16.mxu1 %v3856_v62 }
 0x36b   : > { %3449 = vmatpush3.bf16.msra.mxu0 %v3448_v4  ;;  %v3499_v4 = vpack.c.bf16 %v1604_v3, %v1603_v2  ;;  %v1968_v2 = vld [vmem:[#allocation2 + $0x5b8] sm:$0xff] }
 0x36c   : > { %3450 = vmatprep.subr.bf16.mxu0 %v3856_v62 }
 0x36f   : > { %3452 = vmatpush3.bf16.msra.mxu0 %v3451_v7  ;;  %v3502_v7 = vpack.c.bf16 %v1606_v6, %v1605_v5  ;;  %v1863_v6 = vld [vmem:[#allocation2 + $0x530] sm:$0xff] }
 0x370   : > { %3453 = vmatprep.subr.bf16.mxu0 %v3856_v62 }
 0x373   : > { %3455 = vmatpush3.bf16.msra.mxu0 %v3454_v10  ;;  %v3481_v10 = vpack.c.bf16 %v1620_v9, %v1619_v8  ;;  %v1969_v8 = vld [vmem:[#allocation2 + $0x5c0] sm:$0xff]  ;;  %v1970_v9 = vld [vmem:[#allocation2 + $0x5c8] sm:$0xff] }
 0x374   : > { %3456 = vmatprep.subr.bf16.mxu0 %v3856_v62  ;;  %v3529_v11 = vpack.c.bf16 %v1970_v9, %v1969_v8 }
 0x375   : > { %3482 = vmatpush3.bf16.msra.mxu1 %v3481_v10  ;;  %v1864_v10 = vld [vmem:[#allocation2 + $0x538] sm:$0xff] }
 0x376   : > { %3504 = vmatprep.subr.bf16.mxu1 %v3856_v62 }
 0x377   : > { %3458 = vmatpush3.bf16.msra.mxu0 %v3457_v13 }
 0x378   : > { %3459 = vmatprep.subr.bf16.mxu0 %v3856_v62 }
 0x37b   : > { %3461 = vmatpush3.bf16.msra.mxu0 %v3460_v16  ;;  %v1769_v16 = vld [vmem:[#allocation2 + $0x4d0] sm:$0xff] }
 0x37c   : > { %3051 = vmatprep.subr.mxu0 %v3858_v63 }
 0x37f   : > { %3052 = vmatpush3.msra.mxu0 %v1417_v17  ;;  %v1770_v17 = vld [vmem:[#allocation2 + $0x4d8] sm:$0xff] }
 0x380   : > { %3054 = vmatmul.mubr.msk.f32.vlgmr.msra.gmra.mrb[18].mxu0 %vm1131_vm5, %v4102_v43  ;;  %3056 = vmatprep.subr.mxu0 %v3858_v63  ;;  %v2509_v43 = vld [vmem:[#allocation2 + $0x250] ss:$0 sm:$0xff]  ;;  %v3508_v20 = vpack.c.bf16 %v1770_v17, %v1769_v16  ;;  %v1973_v16 = vld [vmem:[#allocation2 + $0x5e0] sm:$0xff]  ;;  %v1974_v17 = vld [vmem:[#allocation2 + $0x5e8] sm:$0xff] }
 0x381   : > { %3058 = vmatprep.mubr.msk.f32.mxu0 %vm3857_vm4, %v3858_v63 }
 0x417   : > { %v1326_v37 = vpop.f32.mrb[14].mxu0 }
 0x418   : > { %v2989_v38 = vpop.f32.mrb[15].mxu0 }
 0x435   : > { %v1399_v39 = vpop.f32.mrb[16].mxu0 }
 0x436   : > { %v1400_v40 = vadd.f32 %v1399_v39, %v1326_v37  ;;  %v3022_v41 = vpop.f32.mrb[17].mxu0  ;;  %v1780_v37 = vld [vmem:[#allocation2 + $0x528] sm:$0xff]  ;;  %v1955_v39 = vld [vmem:[#allocation2 + $0x550] sm:$0xff] }
 0x437   : > { %v3523_v38 = vpack.c.bf16 %v1780_v37, %v1779_v36  ;;  %v2129_v36 = vld [vmem:[#allocation2 + $0x630] sm:$0xff]  ;;  %v2130_v37 = vld [vmem:[#allocation2 + $0x638] sm:$0xff] }
 0x453   : > { %v1487_v42 = vpop.f32.mrb[18].mxu0 }
 0x454   : > { %v1491_v46 = vadd.f32 %v1487_v42, %v1400_v40  ;;  %v3055_v47 = vpop.f32.mrb[19].mxu0  ;;  %v1956_v40 = vld [vmem:[#allocation2 + $0x558] sm:$0xff]  ;;  %v1957_v42 = vld [vmem:[#allocation2 + $0x560] sm:$0xff] }
 0x455   : > { %v3544_v41 = vpack.c.bf16 %v1956_v40, %v1955_v39  ;;  %v3568_v40 = vpack.c.bf16 %v2130_v37, %v2129_v36 }
 0x456   : > { %v1497_v48 = vadd.f32 %v2509_v43, %v1491_v46  ;;  %v1958_v43 = vld [vmem:[#allocation2 + $0x568] sm:$0xff]  ;;  %v1960_v46 = vld [vmem:[#allocation2 + $0x578] sm:$0xff] }
 0x457   : > { %v3547_v44 = vpack.c.bf16 %v1958_v43, %v1957_v42  ;;  %v3550_v47 = vpack.c.bf16 %v1960_v46, %v1959_v45  ;;  %v2132_v42 = vld [vmem:[#allocation2 + $0x648] sm:$0xff]  ;;  %v2135_v46 = vld [vmem:[#allocation2 + $0x660] sm:$0xff] }
 0x458   : > { %3057 = vmatpush3.msra.mxu0 %v1497_v48  ;;  %1499 = vst.msk [vmem:[%s246_s15] sm:$0xff] %vm1498_vm7, %v1497_v48  ;;  %v1961_v48 = vld [vmem:[#allocation2 + $0x580] sm:$0xff] }
 0x459   : > { %3059 = vmatmul.mubr.msk.f32.vlgmr.msra.gmra.mrb[20].mxu0 %vm1503_vm8, %v1500_v49  ;;  %3483 = vmatprep.subr.bf16.mxu0 %v3856_v62  ;;  %v1962_v49 = vld [vmem:[#allocation2 + $0x588] sm:$0xff] }
 0x45a   : > { %3061 = vmatprep.mubr.msk.f32.mxu0 %vm3857_vm4, %v3858_v63  ;;  %3485 = vmatpush3.bf16.msra.mxu0 %v3484_v50  ;;  %v3553_v50 = vpack.c.bf16 %v1962_v49, %v1961_v48 }
 0x45b   : > { %3486 = vmatprep.subr.bf16.mxu0 %v3856_v62 }
 0x45d   : > { %3062 = vmatmul.mubr.msk.f32.gmra.mrb[22].mxu0 %vm1503_vm8, %v1501_v53  ;;  %v3556_v53 = vpack.c.bf16 %v1964_v52, %v1963_v51 }
 0x45e   : > { %3064 = vmatprep.mubr.msk.f32.mxu0 %vm3857_vm4, %v3858_v63  ;;  %3488 = vmatpush3.bf16.msra.mxu0 %v3487_v54  ;;  %v1965_v54 = vld [vmem:[#allocation2 + $0x5a0] sm:$0xff] }
 0x45f   : > { %3489 = vmatprep.subr.bf16.mxu0 %v3856_v62  ;;  %v3559_v56 = vpack.c.bf16 %v1966_v55, %v1965_v54 }
 0x461   : > { %3065 = vmatmul.mubr.msk.f32.gmra.mrb[24].mxu0 %vm1503_vm8, %v1502_v57 }
 0x462   : > { %3491 = vmatpush3.bf16.msra.mxu0 %v3490_v58  ;;  %3126 = vmatprep.mubr.msk.f32.mxu0 %vm3857_vm4, %v3858_v63 }
 0x463   : > { %3492 = vmatprep.subr.bf16.mxu0 %v3856_v62 }
 0x466   : > { %3494 = vmatpush3.bf16.msra.mxu0 %v3493_v61 }
 0x467   : > { %3495 = vmatprep.subr.bf16.mxu0 %v3856_v62 }
 0x46a   : > { %3497 = vmatpush3.bf16.msra.mxu0 %v3496_v21  ;;  %v1967_v21 = vld [vmem:[#allocation2 + $0x5b0] sm:$0xff] }
 0x46b   : > { %3498 = vmatprep.subr.bf16.mxu0 %v3856_v62 }
 0x46e   : > { %3500 = vmatpush3.bf16.msra.mxu0 %v3499_v4 }
 0x46f   : > { %3501 = vmatprep.subr.bf16.mxu0 %v3856_v62 }
 0x472   : > { %3503 = vmatpush3.bf16.msra.mxu0 %v3502_v7  ;;  %v3526_v7 = vpack.c.bf16 %v1968_v2, %v1967_v21 }
 0x473   : > { %3160 = vmatprep.subr.mxu0 %v3858_v63 }
 0x52c   : > { %v1579_v13 = vpop.f32.mrb[20].mxu0 }
 0x52d   : > { %v3060_v14 = vpop.f32.mrb[21].mxu0  ;;  %3127 = vmatmul.mubr.msk.f32.vlgmr.msra.gmra.mrb[26].mxu0 %vm1498_vm7, %v1579_v13  ;;  %v1972_v13 = vld [vmem:[#allocation2 + $0x5d8] sm:$0xff] }
 0x52e   : > { %3162 = vmatprep.mubr.msk.f32.mxu0 %vm3857_vm4, %v3858_v63  ;;  %v1865_v14 = vld [vmem:[#allocation2 + $0x540] sm:$0xff] }
 0x530   : > { %v1584_v18 = vpop.f32.mrb[22].mxu0 }
 0x531   : > { %v3063_v19 = vpop.f32.mrb[23].mxu0  ;;  %3096 = vmatmul.mubr.msk.f32.vlgmr.msra.gmra.mrb[8].mxu1 %vm1498_vm7, %v1584_v18  ;;  %v3535_v18 = vpack.c.bf16 %v1974_v17, %v1973_v16 }
 0x532   : > { %3506 = vmatpush3.bf16.msra.mxu1 %v3505_v15  ;;  %3157 = vmatprep.mubr.msk.f32.mxu1 %vm3857_vm4, %v3858_v63  ;;  %v3532_v15 = vpack.c.bf16 %v1972_v13, %v1971_v12  ;;  %v1975_v19 = vld [vmem:[#allocation2 + $0x5f0] sm:$0xff] }
 0x533   : > { %3507 = vmatprep.subr.bf16.mxu1 %v3856_v62 }
 0x534   : > { %v1589_v24 = vpop.f32.mrb[24].mxu0 }
 0x535   : > { %v3066_v25 = vpop.f32.mrb[25].mxu0 }
 0x536   : > { %3509 = vmatpush3.bf16.msra.mxu1 %v3508_v20  ;;  %v1976_v20 = vld [vmem:[#allocation2 + $0x5f8] sm:$0xff] }
 0x537   : > { %3510 = vmatprep.subr.bf16.mxu1 %v3856_v62  ;;  %v3538_v22 = vpack.c.bf16 %v1976_v20, %v1975_v19 }
 0x53a   : > { %3512 = vmatpush3.bf16.msra.mxu1 %v3511_v26  ;;  %v2125_v26 = vld [vmem:[#allocation2 + $0x610] sm:$0xff] }
 0x53b   : > { %3513 = vmatprep.subr.bf16.mxu1 %v3856_v62  ;;  %v3562_v30 = vpack.c.bf16 %v2126_v27, %v2125_v26 }
 0x53e   : > { %3515 = vmatpush3.bf16.msra.mxu1 %v3514_v29 }
 0x53f   : > { %3516 = vmatprep.subr.bf16.mxu1 %v3856_v62 }
 0x542   : > { %3518 = vmatpush3.bf16.msra.mxu1 %v3517_v32  ;;  %v2128_v32 = vld [vmem:[#allocation2 + $0x628] sm:$0xff] }
 0x543   : > { %3519 = vmatprep.subr.bf16.mxu1 %v3856_v62 }
 0x546   : > { %3521 = vmatpush3.bf16.msra.mxu1 %v3520_v35  ;;  %v3565_v35 = vpack.c.bf16 %v2128_v32, %v2127_v31 }
 0x547   : > { %3522 = vmatprep.subr.bf16.mxu1 %v3856_v62 }
 0x54a   : > { %3524 = vmatpush3.bf16.msra.mxu1 %v3523_v38 }
 0x54b   : > { %3543 = vmatprep.subr.bf16.mxu1 %v3856_v62 }
 0x54d   : > { %3158 = vmatmul.mubr.msk.f32.vlgmr.msra.gmra.mrb[10].mxu1 %vm1498_vm7, %v1589_v24  ;;  %v1978_v24 = vld [vmem:[#allocation2 + $0x608] sm:$0xff] }
 0x54e   : > { %3222 = vmatprep.mubr.msk.f32.mxu1 %vm3857_vm4, %v3858_v63  ;;  %3545 = vmatpush3.bf16.msra.mxu1 %v3544_v41  ;;  %v3541_v25 = vpack.c.bf16 %v1978_v24, %v1977_v23  ;;  %v2131_v41 = vld [vmem:[#allocation2 + $0x640] sm:$0xff] }
 0x54f   : > { %3546 = vmatprep.subr.bf16.mxu1 %v3856_v62  ;;  %v3571_v43 = vpack.c.bf16 %v2132_v42, %v2131_v41 }
 0x552   : > { %3548 = vmatpush3.bf16.msra.mxu1 %v3547_v44  ;;  %v2134_v44 = vld [vmem:[#allocation2 + $0x658] sm:$0xff] }
 0x553   : > { %3549 = vmatprep.subr.bf16.mxu1 %v3856_v62 }
 0x556   : > { %3551 = vmatpush3.bf16.msra.mxu1 %v3550_v47  ;;  %v2136_v47 = vld [vmem:[#allocation2 + $0x668] sm:$0xff] }
 0x557   : > { %3552 = vmatprep.subr.bf16.mxu1 %v3856_v62  ;;  %v3577_v48 = vpack.c.bf16 %v2136_v47, %v2135_v46 }
 0x55a   : > { %3554 = vmatpush3.bf16.msra.mxu1 %v3553_v50 }
 0x55b   : > { %3555 = vmatprep.subr.bf16.mxu1 %v3856_v62 }
 0x55e   : > { %3557 = vmatpush3.bf16.msra.mxu1 %v3556_v53 }
 0x55f   : > { %3558 = vmatprep.subr.bf16.mxu1 %v3856_v62 }
 0x562   : > { %3560 = vmatpush3.bf16.msra.mxu1 %v3559_v56 }
 0x600   : > { %v1763_v57 = vpop.f32.mrb[26].mxu0 }
 0x601   : > { %v3128_v58 = vpop.f32.mrb[27].mxu0 }
 0x604   : > { %v1690_v59 = vpop.f32.mrb[8].mxu1 }
 0x605   : > { %v1764_v60 = vadd.f32 %v1763_v57, %v1690_v59  ;;  %v3097_v61 = vpop.f32.mrb[9].mxu1 }
 0x620   : > { %v1850_v0 = vpop.f32.mrb[10].mxu1 }
 0x621   : > { %v1854_v3 = vadd.f32 %v1850_v0, %v1764_v60  ;;  %v3159_v4 = vpop.f32.mrb[11].mxu1 }
 0x623   : > { %v1860_v5 = vadd.f32 %v2516_v1, %v1854_v3 }
 0x625   : > { %3161 = vmatpush3.msra.mxu0 %v1860_v5  ;;  %1862 = vst.msk [vmem:[%s4367_s16] sm:$0xff] %vm1861_vm9, %v1860_v5 }
 0x626   : > { %3163 = vmatmul.mubr.msk.f32.vlgmr.msra.gmra.mrb[28].mxu0 %vm1503_vm8, %v1863_v6  ;;  %3525 = vmatprep.subr.bf16.mxu0 %v3856_v62 }
 0x627   : > { %3165 = vmatprep.mubr.msk.f32.mxu0 %vm3857_vm4, %v3858_v63  ;;  %3527 = vmatpush3.bf16.msra.mxu0 %v3526_v7 }
 0x628   : > { %3528 = vmatprep.subr.bf16.mxu0 %v3856_v62 }
 0x62a   : > { %3166 = vmatmul.mubr.msk.f32.gmra.mrb[30].mxu0 %vm1503_vm8, %v1864_v10 }
 0x62b   : > { %3168 = vmatprep.mubr.msk.f32.mxu0 %vm3857_vm4, %v3858_v63  ;;  %3530 = vmatpush3.bf16.msra.mxu0 %v3529_v11 }
 0x62c   : > { %3531 = vmatprep.subr.bf16.mxu0 %v3856_v62 }
 0x62e   : > { %3169 = vmatmul.mubr.msk.f32.gmra.mrb[32].mxu0 %vm1503_vm8, %v1865_v14 }
 0x62f   : > { %3533 = vmatpush3.bf16.msra.mxu0 %v3532_v15  ;;  %3195 = vmatprep.mubr.msk.f32.mxu0 %vm3857_vm4, %v3858_v63 }
 0x630   : > { %3534 = vmatprep.subr.bf16.mxu0 %v3856_v62 }
 0x633   : > { %3536 = vmatpush3.bf16.msra.mxu0 %v3535_v18 }
 0x634   : > { %3537 = vmatprep.subr.bf16.mxu0 %v3856_v62 }
 0x637   : > { %3539 = vmatpush3.bf16.msra.mxu0 %v3538_v22 }
 0x638   : > { %3540 = vmatprep.subr.bf16.mxu0 %v3856_v62 }
 0x63b   : > { %3542 = vmatpush3.bf16.msra.mxu0 %v3541_v25 }
 0x63c   : > { %3561 = vmatprep.subr.bf16.mxu0 %v3856_v62 }
 0x6f9   : > { %v1941_v28 = vpop.f32.mrb[28].mxu0 }
 0x6fa   : > { %v3164_v29 = vpop.f32.mrb[29].mxu0  ;;  %3223 = vmatmul.mubr.msk.f32.vlgmr.msra.gmra.mrb[12].mxu1 %vm1861_vm9, %v1941_v28 }
 0x6fd   : > { %v1946_v33 = vpop.f32.mrb[30].mxu0 }
 0x6fe   : > { %3196 = vmatmul.mubr.msk.f32.vlgmr.msra.gmra.mrb[34].mxu0 %vm1861_vm9, %v1946_v33  ;;  %v3167_v34 = vpop.f32.mrb[31].mxu0 }
 0x6ff   : > { %3563 = vmatpush3.bf16.msra.mxu0 %v3562_v30  ;;  %3249 = vmatprep.mubr.msk.f32.mxu0 %vm3857_vm4, %v3858_v63  ;;  %v2133_v63 = vld [vmem:[#allocation2 + $0x650] sm:$0xff] }
 0x700   : > { %3564 = vmatprep.subr.bf16.mxu0 %v3856_v62  ;;  %v3574_v45 = vpack.c.bf16 %v2134_v44, %v2133_v63 }
 0x701   : > { %v1951_v38 = vpop.f32.mrb[32].mxu0 }
 0x702   : > { %v3170_v39 = vpop.f32.mrb[33].mxu0 }
 0x703   : > { %3566 = vmatpush3.bf16.msra.mxu0 %v3565_v35 }
 0x704   : > { %3567 = vmatprep.subr.bf16.mxu0 %v3856_v62 }
 0x707   : > { %3569 = vmatpush3.bf16.msra.mxu0 %v3568_v40 }
 0x708   : > { %3570 = vmatprep.subr.bf16.mxu0 %v3856_v62 }
 0x70b   : > { %3572 = vmatpush3.bf16.msra.mxu0 %v3571_v43 }
 0x70c   : > { %3573 = vmatprep.subr.bf16.mxu0 %v3856_v62 }
 0x70f   : > { %3575 = vmatpush3.bf16.msra.mxu0 %v3574_v45 }
 0x710   : > { %3576 = vmatprep.subr.bf16.mxu0 %v3856_v62 }
 0x713   : > { %3578 = vmatpush3.bf16.msra.mxu0 %v3577_v48 }
 0x716   : > { %3250 = vmatmul.mubr.msk.f32.vlgmr.msra.gmra.mrb[36].mxu0 %vm1861_vm9, %v1951_v38 }
 0x717   : > { %3705 = shalt.err (!%p3702_p7)
}
 0x718   : > { %s3706_s15 = scalar_lea.hbm %s4219_s10, 128  ;;  %s3710_s13 = scalar_lea.hbm %s4360_s3, 256 }
 0x719   : > { %p3707_p8 = scmp.ne.s32.totalorder %s4219_s10, %s3706_s15  ;;  %p3711_p1 = scmp.lt.u32.totalorder %s4219_s10, %s4360_s3 }
 0x71a   : > { %p3712_p0 = scmp.lt.u32.totalorder %s3710_s13, %s3706_s15  ;;  %p3714_p6 = scmp.lt.u32.totalorder %s3706_s15, %s4219_s10 }
 0x71b   : > { %p3708_p11 = pnand %p3707_p8, %p4381_p9 }
 0x71c   : > { %p3713_p5 = por %p3712_p0, %p3711_p1 }
 0x71d   : > { %p3709_p13 = pneg %p3708_p11 }
 0x71e   : > { %p3715_p10 = por %p3714_p6, %p3713_p5 }
 0x720   : > { %p3716_p12 = pnand %p3715_p10, %p3709_p13 }
 0x722   : > { %3719 = shalt.err (!%p3716_p12)
}
 0x723   : > { %3596 = dma.vmem_to_hbm [thread:$0]  (%p4381_p9), %s4223_s11, 128, %s4219_s10, %s4226_s12  }
 0x724   : > { %s4255_s6 = scalar_lea.hbm %s4359_s2, %s2536_s8  ;;  %s4261_s9 = scalar_lea.hbm %s4361_s4, %s4213_s26 }
 0x725   : > { %s2220_s13 = scalar_lea.sflag [#allocation4], %s4081_s30  ;;  %s3720_s23 = scalar_lea.vmem %s4209_s17, 256 }
 0x726   : > { %p3721_p2 = scmp.ne.s32.totalorder %s4209_s17, %s3720_s23  ;;  %s3860_s0 = smov [#allocation5]  }
 0x727   : > { %s3724_s1 = sshll.u32 %s3860_s0, 4  ;;  %s3725_s1 = int_to_ptr.vmem [resolvable:$false] %s3724_s1 }
 0x728   : > { %p3722_p3 = pnand %p3721_p2, %p4381_p9  ;;  %s3726_s22 = scalar_lea.vmem %s3725_s1, 512 }
 0x729   : > { %p3727_p7 = scmp.lt.s32.totalorder %s4209_s17, %s3725_s1  ;;  %p3728_p8 = scmp.lt.s32.totalorder %s3726_s22, %s3720_s23 }
 0x72a   : > { %p3723_p4 = pneg %p3722_p3 }
 0x72b   : > { %p3729_p11 = por %p3728_p8, %p3727_p7 }
 0x72d   : > { %p3730_p13 = pnand %p3729_p11, %p3723_p4 }
 0x72f   : > { %3733 = shalt.err (!%p3730_p13)
}
 0x730   : > { %s3734_s10 = scalar_lea.hbm %s4255_s6, 256  ;;  %s3738_s0 = scalar_lea.hbm %s4359_s2, 512 }
 0x731   : > { %p3735_p1 = scmp.ne.s32.totalorder %s4255_s6, %s3734_s10  ;;  %p3739_p6 = scmp.lt.u32.totalorder %s4255_s6, %s4359_s2 }
 0x732   : > { %p3740_p10 = scmp.lt.u32.totalorder %s3738_s0, %s3734_s10  ;;  %p3742_p2 = scmp.lt.u32.totalorder %s3734_s10, %s4255_s6 }
 0x733   : > { %p3736_p0 = pnand %p3735_p1, %p4381_p9 }
 0x734   : > { %p3741_p12 = por %p3740_p10, %p3739_p6 }
 0x735   : > { %p3737_p5 = pneg %p3736_p0 }
 0x736   : > { %p3743_p3 = por %p3742_p2, %p3741_p12 }
 0x738   : > { %p3744_p4 = pnand %p3743_p3, %p3737_p5 }
 0x73a   : > { %3747 = shalt.err (!%p3744_p4)
}
 0x73b   : > { %s3861_s7 = smov 128   ;;  %s3862_s15 = smov 8  }
 0x73c   : > { %3595 = dma.vmem_to_hbm [thread:$0]  (%p4381_p9), %s4209_s17, 256, %s4255_s6, %s2220_s13, %s3861_s7, %s3861_s7, %s3862_s15  }
 0x73d   : > { %s4382_s25 = scalar_lea.vmem [#allocation8], %s4133_s14  ;;  %s3863_s10 = smov [#allocation8]  }
 0x73e   : > { %s2277_s23 = sshll.u32 %s4382_s25, 4  ;;  %s3752_s11 = sshll.u32 %s3863_s10, 4  ;;  %s2278_s23 = int_to_ptr.vmem [resolvable:$true] %s2277_s23  ;;  %s3753_s11 = int_to_ptr.vmem [resolvable:$false] %s3752_s11 }
 0x73f   : > { %s3748_s22 = scalar_lea.vmem %s2278_s23, 128  ;;  %s3754_s8 = scalar_lea.vmem %s3753_s11, 256 }
 0x740   : > { %p3749_p7 = scmp.ne.s32.totalorder %s2278_s23, %s3748_s22  ;;  %p3755_p13 = scmp.lt.s32.totalorder %s2278_s23, %s3753_s11 }
 0x741   : > { %p3756_p1 = scmp.lt.s32.totalorder %s3754_s8, %s3748_s22 }
 0x742   : > { %p3750_p8 = pnand %p3749_p7, %p4381_p9 }
 0x743   : > { %p3757_p0 = por %p3756_p1, %p3755_p13 }
 0x744   : > { %p3751_p11 = pneg %p3750_p8 }
 0x746   : > { %p3758_p5 = pnand %p3757_p0, %p3751_p11 }
 0x748   : > { %3761 = shalt.err (!%p3758_p5)
}
 0x749   : > { %s3762_s17 = scalar_lea.hbm %s4261_s9, 128  ;;  %s3766_s0 = scalar_lea.hbm %s4361_s4, 256 }
 0x74a   : > { %p3763_p6 = scmp.ne.s32.totalorder %s4261_s9, %s3762_s17  ;;  %p3767_p2 = scmp.lt.u32.totalorder %s4261_s9, %s4361_s4 }
 0x74b   : > { %p3768_p3 = scmp.lt.u32.totalorder %s3766_s0, %s3762_s17  ;;  %p3770_p7 = scmp.lt.u32.totalorder %s3762_s17, %s4261_s9 }
 0x74c   : > { %p3764_p10 = pnand %p3763_p6, %p4381_p9 }
 0x74d   : > { %p3769_p4 = por %p3768_p3, %p3767_p2 }
 0x74e   : > { %p3765_p12 = pneg %p3764_p10 }
 0x74f   : > { %p3771_p8 = por %p3770_p7, %p3769_p4 }
 0x751   : > { %p3772_p11 = pnand %p3771_p8, %p3765_p12 }
 0x753   : > { %3775 = shalt.err (!%p3772_p11)
}
 0x754   : > { %3597 = dma.vmem_to_hbm [thread:$0]  (%p4381_p9), %s2278_s23, 128, %s4261_s9, %s4226_s12   ;;  %v2523_v54 = vld [vmem:[#allocation2 + $0x548] ss:$0 sm:$0xff]  ;;  %vm2217_vm10 = vcmask 523264  }
 0x755   : > { %s260_s7 = scalar_lea.vmem [#allocation9], %s4133_s14  ;;  %s4312_s10 = scalar_lea.hbm %s4362_s5, %s4213_s26 }
 0x756   : > { %s2290_s15 = sshll.u32 %s260_s7, 4  ;;  %s2235_s12 = scalar_lea.sflag [#allocation10], %s4081_s30  ;;  %s4314_s15 = int_to_ptr.vmem [resolvable:$true] %s2290_s15 }
 0x757   : > { %s3776_s9 = scalar_lea.vmem %s4314_s15, 128  ;;  %s3864_s14 = smov [#allocation9]  }
 0x758   : > { %p3777_p13 = scmp.ne.s32.totalorder %s4314_s15, %s3776_s9  ;;  %s3780_s23 = sshll.u32 %s3864_s14, 4  ;;  %s3781_s23 = int_to_ptr.vmem [resolvable:$false] %s3780_s23 }
 0x759   : > { %s3782_s11 = scalar_lea.vmem %s3781_s23, 256  ;;  %p3783_p5 = scmp.lt.s32.totalorder %s4314_s15, %s3781_s23 }
 0x75a   : > { %p3778_p1 = pnand %p3777_p13, %p4381_p9  ;;  %p3784_p6 = scmp.lt.s32.totalorder %s3782_s11, %s3776_s9 }
 0x75c   : > { %p3779_p0 = pneg %p3778_p1  ;;  %p3785_p10 = por %p3784_p6, %p3783_p5 }
 0x75e   : > { %p3786_p12 = pnand %p3785_p10, %p3779_p0 }
 0x7cd   : > { %v2121_v62 = vpop.f32.mrb[12].mxu1 }
 0x7ce   : > { %v3224_v49 = vpop.f32.mrb[13].mxu1 }
 0x7d1   : > { %v2048_v50 = vpop.f32.mrb[34].mxu0 }
 0x7d2   : > { %v2122_v51 = vadd.f32 %v2121_v62, %v2048_v50  ;;  %v3197_v52 = vpop.f32.mrb[35].mxu0 }
 0x7e9   : > { %v2206_v53 = vpop.f32.mrb[36].mxu0 }
 0x7ea   : > { %v2210_v55 = vadd.f32 %v2206_v53, %v2122_v51  ;;  %v3251_v56 = vpop.f32.mrb[37].mxu0 }
 0x7ec   : > { %v2216_v57 = vadd.f32 %v2523_v54, %v2210_v55 }
 0x7ee   : > { %2218 = vst.msk [vmem:[%s260_s7] sm:$0xff] %vm2217_vm10, %v2216_v57 }
 0x7ef   : > { %3789 = shalt.err (!%p3786_p12)
}
 0x7f0   : > { %s3790_s30 = scalar_lea.hbm %s4312_s10, 128  ;;  %s3794_s17 = scalar_lea.hbm %s4362_s5, 256 }
 0x7f1   : > { %p3791_p2 = scmp.ne.s32.totalorder %s4312_s10, %s3790_s30  ;;  %p3795_p7 = scmp.lt.u32.totalorder %s4312_s10, %s4362_s5 }
 0x7f2   : > { %p3796_p8 = scmp.lt.u32.totalorder %s3794_s17, %s3790_s30  ;;  %p3798_p13 = scmp.lt.u32.totalorder %s3790_s30, %s4312_s10 }
 0x7f3   : > { %p3792_p3 = pnand %p3791_p2, %p4381_p9 }
 0x7f4   : > { %p3797_p11 = por %p3796_p8, %p3795_p7 }
 0x7f5   : > { %p3793_p4 = pneg %p3792_p3 }
 0x7f6   : > { %p3799_p1 = por %p3798_p13, %p3797_p11 }
 0x7f8   : > { %p3800_p0 = pnand %p3799_p1, %p3793_p4 }
 0x7fa   : > { %3803 = shalt.err (!%p3800_p0)
}
 0x7fb   : > { %3598 = dma.vmem_to_hbm [thread:$0]  (%p4381_p9), %s4314_s15, 128, %s4312_s10, %s2235_s12  }
 0x7fc PF: > { %p3622_p5 = scmp.ge.s32.totalorder %s3850_s21, 2  ;;  %s2302_s0 = sand.u32 1, %s3838_s18  }
 0x7fd   : > { %p4383_p6 = scmp.ne.s32.totalorder %s4371_s29, 0  ;;  %s2303_s16 = scalar_lea.sflag [#allocation4], %s2302_s0 }
 0x7ff   : > { %p3608_p10 = pnand %p3622_p5, %p4383_p6 }
 0x801   : > { %3825 = dma.done.wait (!%p3608_p10), %s2303_s16, 256  }
 0x802   : > { %3827 = vsyncadd (!%p3608_p10), %s2303_s16, 4294967040  ;;  %s4384_s1 = sadd.s32 4294967294, %s3850_s21  }
 0x803   : > { %s2311_s7 = sand.u32 1, %s4384_s1  }
 0x804   : > { %s2312_s25 = scalar_lea.sflag [#allocation7], %s2311_s7 }
 0x805   : > { %3829 = dma.done.wait (!%p3608_p10), %s2312_s25, 256  }
 0x806   : > { %3831 = vsyncadd (!%p3608_p10), %s2312_s25, 4294967040  ;;  %s2330_s28 = scalar_lea.sflag [#allocation10], %s2302_s0 }
 0x807   : > { %3833 = dma.done.wait (!%p3608_p10), %s2330_s28, 128  }
 0x808   : > { %3835 = vsyncadd (!%p3608_p10), %s2330_s28, 4294967168  ;;  %p23_p9 = scmp.ge.s32.totalorder %s3920_s24, 4   ;;  %s4385_s18 = smov %s3842_s19 }
 0x809   : > { %s4386_s19 = smov %s3846_s20  ;;  %s4387_s20 = smov %s3933_s27 }
 0x80a   : > { %s4388_s21 = smov %s3920_s24  ;;  %25 = sbr.rel (!%p23_p9) target bundleno = 11 (0xb), region = 117 }
 0x811   :  { %2335 = vsyncpa [#allocation3], 1 }
 0x812   :  { %2337 = vsyncpa [#allocation3 + $0x1], 1 }
 0x813   :  { %2338 = vsyncpa [#allocation4], 1 }
 0x814   :  { %2340 = vsyncpa [#allocation4 + $0x1], 1 }
 0x815   :  { %2341 = vsyncpa [#allocation7], 1 }
 0x816   :  { %2343 = vsyncpa [#allocation7 + $0x1], 1 }
 0x817   :  { %2344 = vsyncpa [#allocation10], 1 }
 0x818   :  { %2346 = vsyncpa [#allocation10 + $0x1], 1 }

</bundles_post_ra>
